<compile_context>
chip_gen: v5e
topology: v5e:2x2
jax: 0.10.0
libtpu: 0.0.40
codegen_flags: <defaults>
</compile_context>

<pallas_src>
import functools

import jax
import jax.numpy as jnp
from jax import lax
from jax.experimental import pallas as pl
from jax.experimental.pallas import tpu as pltpu

EPS = 1e-12  # matches F.normalize(p=2, eps=1e-12)


def _l2norm(t, axis=-1):
    n = jnp.sqrt(jnp.sum(t * t, axis=axis, keepdims=True))
    return t / jnp.maximum(n, EPS)


def _pick_tile(n, target, multiple=8):
    """Largest tile t <= target dividing n with t % multiple == 0, else n (full)."""
    if n <= target:
        return n
    for t in range(min(target, n), 0, -1):
        if n % t == 0 and t % multiple == 0:
            return t
    return n


def _vmem_cap_bytes():
    try:
        cap = getattr(pltpu.get_tpu_info(), "vmem_capacity_bytes", None)
        if cap:
            return int(cap)
    except Exception:
        pass
    return 64 << 20  # conservative (v7x per-TC VMEM)


def _vmem_limit(est_bytes):
    # Generation-aware clamp: ~78% of physical VMEM (≈100 MiB on v5e/v6e,
    # ≈50 MiB on v7x); never below the 32 MiB default scoped limit.
    cap = _vmem_cap_bytes()
    return int(min(max(est_bytes, 32 << 20), int(cap * 0.78)))


# ----------------------------------------------------------------------------
# Kernel 1: fused QKV projection + per-head L2 norm + q/k scaling,
#           outputs written head-major (and K pre-transposed) for kernel 2.
# ----------------------------------------------------------------------------
def qkv_project_kernel(x_ref, wqkv_ref, bd_ref, qs_ref, ks_ref,
                       q_ref, k_ref, v_ref, *, heads, dim_head):
    hd = heads * dim_head
    x = x_ref[0]                       # (Tm, D)        compute dtype
    w = wqkv_ref[...]                  # (D, 3*H*dh)    pre-transposed -> NN dot

    qkv = jnp.dot(x, w, preferred_element_type=jnp.float32)      # (Tm, 3hd) f32
    q = qkv[:, :hd]
    k = qkv[:, hd:2 * hd]
    v = qkv[:, 2 * hd:]

    # Per-head sum-of-squares via one matmul against a block-diagonal ones
    # matrix: stays lane-dense, rides the otherwise idle MXU slot.
    bd = bd_ref[...]                   # (hd, hd) f32
    ssq_q = jnp.dot(q * q, bd, preferred_element_type=jnp.float32)
    ssq_k = jnp.dot(k * k, bd, preferred_element_type=jnp.float32)
    # F.normalize semantics: t / max(||t||, 1e-12); fold the q/k scales in.
    qn = q * (qs_ref[...] / jnp.maximum(jnp.sqrt(ssq_q), EPS))
    kn = k * (ks_ref[...] / jnp.maximum(jnp.sqrt(ssq_k), EPS))

    # Emit directly in the layouts kernel 2 consumes:
    #   q, v : (B, H, N, dh)      k : (B, H, dh, N)  (for NN score matmuls)
    for h in range(heads):
        sl = slice(h * dim_head, (h + 1) * dim_head)
        q_ref[0, h, :, :] = qn[:, sl].astype(q_ref.dtype)
        v_ref[0, h, :, :] = v[:, sl].astype(v_ref.dtype)
        k_ref[0, h, :, :] = kn[:, sl].astype(k_ref.dtype).T


# ----------------------------------------------------------------------------
# Kernel 2: flash attention (online softmax) + fused output projection.
# ----------------------------------------------------------------------------
def flash_attn_kernel(q_ref, kT_ref, v_ref, wo_ref, o_ref, m_sc, l_sc, acc_sc, *,
                      heads, exp_dtype, approx_recip):
    ki = pl.program_id(2)

    @pl.when(ki == 0)
    def _():
        m_sc[...] = jnp.full_like(m_sc, -jnp.inf)
        l_sc[...] = jnp.zeros_like(l_sc)
        acc_sc[...] = jnp.zeros_like(acc_sc)

    q = q_ref[0]           # (H, Tq, dh)  normalized + scaled
    kT = kT_ref[0]         # (H, dh, Tk)  pre-transposed (lane-dense in Tk)
    v = v_ref[0]           # (H, Tk, dh)

    # Scores for all heads in one batched NN einsum (scale = 1.0, no mask).
    s = jnp.einsum('hqd,hdk->hqk', q, kT,
                   preferred_element_type=jnp.float32)           # (H,Tq,Tk) f32

    m_prev = m_sc[...]
    m_new = jnp.maximum(m_prev, jnp.max(s, axis=-1, keepdims=True))
    alpha = jnp.exp(m_prev - m_new)                               # f32
    # exp optionally in compute dtype (bf16 EUP on v6e/v7x); m/l stay f32.
    p = jnp.exp((s - m_new).astype(exp_dtype))
    l_sc[...] = alpha * l_sc[...] + jnp.sum(p.astype(jnp.float32), axis=-1,
                                            keepdims=True)
    acc_sc[...] = alpha * acc_sc[...] + jnp.einsum(
        'hqk,hkd->hqd', p.astype(v.dtype), v,
        preferred_element_type=jnp.float32)
    m_sc[...] = m_new

    @pl.when(ki == pl.num_programs(2) - 1)
    def _():
        l = l_sc[...]
        inv_l = pl.reciprocal(l, approx=True) if approx_recip else 1.0 / l
        o_heads = acc_sc[...] * inv_l                             # (H,Tq,dh) f32
        # Merge heads once per q tile and run a single Wo matmul with a full
        # H*dh reduction (no per-head epilogue matmuls).
        o_flat = jnp.concatenate([o_heads[h] for h in range(heads)], axis=-1)
        wo = wo_ref[...]                                          # (H*dh, D)
        out = jnp.dot(o_flat.astype(wo.dtype), wo,
                      preferred_element_type=jnp.float32)         # (Tq, D) f32
        o_ref[0] = out.astype(o_ref.dtype)


# ----------------------------------------------------------------------------
# Wrapper
# ----------------------------------------------------------------------------
def attention_forward(x, params, *, heads, dim_head,
                      q_block=256, kv_block=512, row_block=512,
                      compute_dtype=jnp.bfloat16,
                      single_buffer_weights=True,
                      exp_in_compute_dtype=None):
    B, N, D = x.shape
    hd = heads * dim_head
    out_dtype = x.dtype
    cdt = jnp.dtype(compute_dtype)
    isz = cdt.itemsize
    o_isz = jnp.dtype(out_dtype).itemsize

    if exp_in_compute_dtype is None:
        # bf16 exp ~doubles EUP throughput on v6e/v7x; keep f32 elsewhere
        # (v5e has no bf16 EUP, and f32 compute path stays exact).
        exp_in_compute_dtype = cdt == jnp.dtype(jnp.bfloat16)
    exp_dtype = cdt if exp_in_compute_dtype else jnp.float32
    approx_recip = cdt == jnp.dtype(jnp.bfloat16)

    # NormLinear parametrization (per-forward weight prep, f32, batch-shared):
    #   to_q/to_k/to_v normalize rows (input dim); to_out normalizes dim 0.
    wq = _l2norm(params["wq"].astype(jnp.float32), axis=-1)
    wk = _l2norm(params["wk"].astype(jnp.float32), axis=-1)
    wv = _l2norm(params["wv"].astype(jnp.float32), axis=-1)
    wo = _l2norm(params["wo"].astype(jnp.float32), axis=0)              # (D, hd)

    # Pre-transpose weights in the wrapper so both kernels run plain NN dots.
    wqkv = jnp.concatenate([wq, wk, wv], axis=0).T.astype(cdt)          # (D, 3hd)
    wo_r = wo.T.astype(cdt)                                             # (hd, D)
    bd = jnp.kron(jnp.eye(heads, dtype=jnp.float32),
                  jnp.ones((dim_head, dim_head), jnp.float32))          # (hd, hd)
    qs = params["q_scale"].reshape(1, hd).astype(jnp.float32)
    ks = params["k_scale"].reshape(1, hd).astype(jnp.float32)
    x_c = x.astype(cdt)

    # tm / tk become lane dims of the transposed-K blocks -> 128-aligned.
    tm = _pick_tile(N, row_block, 128)
    tq = _pick_tile(N, q_block, 8)
    tk = _pick_tile(N, kv_block, 128)

    def _resident(shape, index_map, single_buf):
        if single_buf:
            # Grid-invariant block: single-buffer to halve its VMEM footprint.
            return pl.BlockSpec(shape, index_map, pipeline_mode=pl.Buffered(1))
        return pl.BlockSpec(shape, index_map)

    def _run(single_buf):
        wbuf = 1 if single_buf else 2

        # ------------- Kernel 1: fused QKV + per-head L2 norm ---------------
        k1_est = (2 * tm * D * isz                                   # x blocks
                  + wbuf * (D * 3 * hd * isz + hd * hd * 4 + 2 * hd * 4)
                  + 2 * 3 * tm * hd * isz                            # q/k/v out
                  + 8 * tm * hd * 4                                  # f32 temps
                  + (2 << 20))
        qkv_fn = pl.pallas_call(
            functools.partial(qkv_project_kernel, heads=heads,
                              dim_head=dim_head),
            out_shape=(jax.ShapeDtypeStruct((B, heads, N, dim_head), cdt),
                       jax.ShapeDtypeStruct((B, heads, dim_head, N), cdt),
                       jax.ShapeDtypeStruct((B, heads, N, dim_head), cdt)),
            grid=(B, N // tm),
            in_specs=[
                pl.BlockSpec((1, tm, D), lambda b, m: (b, m, 0)),
                _resident((D, 3 * hd), lambda b, m: (0, 0), single_buf),
                _resident((hd, hd), lambda b, m: (0, 0), single_buf),
                _resident((1, hd), lambda b, m: (0, 0), single_buf),
                _resident((1, hd), lambda b, m: (0, 0), single_buf),
            ],
            out_specs=(
                pl.BlockSpec((1, heads, tm, dim_head),
                             lambda b, m: (b, 0, m, 0)),
                pl.BlockSpec((1, heads, dim_head, tm),
                             lambda b, m: (b, 0, 0, m)),
                pl.BlockSpec((1, heads, tm, dim_head),
                             lambda b, m: (b, 0, m, 0)),
            ),
            compiler_params=pltpu.CompilerParams(
                dimension_semantics=("parallel", "parallel"),
                vmem_limit_bytes=_vmem_limit(k1_est)),
        )
        q_h, kT_h, v_h = qkv_fn(x_c, wqkv, bd, qs, ks)

        # ------------- Kernel 2: flash attention + fused Wo ------------------
        k2_est = (2 * heads * tq * dim_head * isz                    # q blocks
                  + 2 * heads * dim_head * tk * isz                  # kT blocks
                  + 2 * heads * tk * dim_head * isz                  # v blocks
                  + wbuf * hd * D * isz                              # wo
                  + 2 * tq * D * o_isz                               # out blocks
                  + heads * tq * (dim_head + 2 * 128) * 4            # acc + m/l
                  + 3 * heads * tq * tk * 4                          # f32 scores
                  + (2 << 20))
        attn_fn = pl.pallas_call(
            functools.partial(flash_attn_kernel, heads=heads,
                              exp_dtype=exp_dtype, approx_recip=approx_recip),
            out_shape=jax.ShapeDtypeStruct((B, N, D), out_dtype),
            grid=(B, N // tq, N // tk),
            in_specs=[
                pl.BlockSpec((1, heads, tq, dim_head),
                             lambda b, qi, ki: (b, 0, qi, 0)),
                pl.BlockSpec((1, heads, dim_head, tk),
                             lambda b, qi, ki: (b, 0, 0, ki)),
                pl.BlockSpec((1, heads, tk, dim_head),
                             lambda b, qi, ki: (b, 0, ki, 0)),
                _resident((hd, D), lambda b, qi, ki: (0, 0), single_buf),
            ],
            out_specs=pl.BlockSpec((1, tq, D), lambda b, qi, ki: (b, qi, 0)),
            scratch_shapes=[
                pltpu.VMEM((heads, tq, 1), jnp.float32),          # running max m
                pltpu.VMEM((heads, tq, 1), jnp.float32),          # running sum l
                pltpu.VMEM((heads, tq, dim_head), jnp.float32),   # output accum
            ],
            # TODO(synk): on v7x, consider pltpu.CORE_PARALLEL on the leading
            # parallel axis to guarantee 2-TensorCore sharding.
            compiler_params=pltpu.CompilerParams(
                dimension_semantics=("parallel", "parallel", "arbitrary"),
                vmem_limit_bytes=_vmem_limit(k2_est)),
        )
        return attn_fn(q_h, kT_h, v_h, wo_r)

    if single_buffer_weights:
        try:
            return _run(True)
        except Exception:
            # pipeline_mode=pl.Buffered(1) unsupported on this JAX/Mosaic
            # version -> fall back to default double buffering.
            pass
    return _run(False)


# ----------------------------------------------------------------------------
# Pure-JAX reference mirroring the PyTorch forward (eval mode).
# ----------------------------------------------------------------------------
def attention_reference(x, params, *, heads, dim_head):
    x = x.astype(jnp.float32)
    wq = _l2norm(params["wq"].astype(jnp.float32), axis=-1)
    wk = _l2norm(params["wk"].astype(jnp.float32), axis=-1)
    wv = _l2norm(params["wv"].astype(jnp.float32), axis=-1)
    wo = _l2norm(params["wo"].astype(jnp.float32), axis=0)
    B, N, D = x.shape

    def split(t):  # b n (h d) -> b h n d
        return t.reshape(B, N, heads, dim_head).transpose(0, 2, 1, 3)

    q = split(x @ wq.T)
    k = split(x @ wk.T)
    v = split(x @ wv.T)
    q = _l2norm(q) * params["q_scale"]
    k = _l2norm(k) * params["k_scale"]
    s = jnp.einsum("bhnd,bhmd->bhnm", q, k)       # scale = 1.0
    p = jax.nn.softmax(s, axis=-1)
    o = jnp.einsum("bhnm,bhmd->bhnd", p, v)
    o = o.transpose(0, 2, 1, 3).reshape(B, N, heads * dim_head)
    return o @ wo.T


if __name__ == "__main__":
    B, N, D = 2, 8, 32
    heads, dim_head = 2, 8
    dim_inner = heads * dim_head

    key = jax.random.PRNGKey(0)
    k1, k2, k3, k4, k5 = jax.random.split(key, 5)
    params = {
        "wq": jax.random.normal(k1, (dim_inner, D), jnp.float32),
        "wk": jax.random.normal(k2, (dim_inner, D), jnp.float32),
        "wv": jax.random.normal(k3, (dim_inner, D), jnp.float32),
        "wo": jax.random.normal(k4, (D, dim_inner), jnp.float32),
        "q_scale": jnp.ones((heads, 1, dim_head), jnp.float32) * dim_head ** 0.25,
        "k_scale": jnp.ones((heads, 1, dim_head), jnp.float32) * dim_head ** 0.25,
    }
    x = jax.random.normal(k5, (B, N, D), jnp.float32)

    ref = attention_reference(x, params, heads=heads, dim_head=dim_head)

    # f32 compute path: strict check (exact exp / reciprocal on this path).
    out32 = attention_forward(x, params, heads=heads, dim_head=dim_head,
                              compute_dtype=jnp.float32)
    out32 = jax.block_until_ready(out32)
    assert out32.shape == (B, N, D)
    assert out32.dtype == x.dtype
    err32 = float(jnp.max(jnp.abs(out32 - ref)))
    assert jnp.allclose(out32, ref, atol=2e-2, rtol=2e-2), err32

    # bf16 matmul path (v6e/v7x MXU; f32 m/l/acc, bf16 exp): loose sanity check.
    outbf = attention_forward(x, params, heads=heads, dim_head=dim_head,
                              compute_dtype=jnp.bfloat16)
    outbf = jax.block_until_ready(outbf)
    errbf = float(jnp.max(jnp.abs(outbf.astype(jnp.float32) - ref)))
    assert jnp.allclose(outbf.astype(jnp.float32), ref, atol=2e-1, rtol=2e-1), errbf

    print("KERNEL_OK")
</pallas_src>

<mosaic_0001>
module attributes {stable_mosaic.version = 11 : i64} {
  func.func @qkv_project_kernel(%arg0: i32, %arg1: i32, %arg2: memref<1x8x32xf32, #tpu.memory_space<vmem>>, %arg3: memref<32x48xf32, #tpu.memory_space<vmem>>, %arg4: memref<16x16xf32, #tpu.memory_space<vmem>>, %arg5: memref<1x16xf32, #tpu.memory_space<vmem>>, %arg6: memref<1x16xf32, #tpu.memory_space<vmem>>, %arg7: memref<1x2x8x8xf32, #tpu.memory_space<vmem>>, %arg8: memref<1x2x8x8xf32, #tpu.memory_space<vmem>>, %arg9: memref<1x2x8x8xf32, #tpu.memory_space<vmem>>) attributes {dimension_semantics = [#tpu.dimension_semantics<parallel>, #tpu.dimension_semantics<parallel>], iteration_bounds = array<i64: 2, 1>, scalar_prefetch = 0 : i64, scratch_operands = 0 : i64, tpu.core_type = #tpu.core_type<tc>, window_params = [{transform_indices = @transform_0, window_bounds = array<i64: 1, 8, 32>}, {pipeline_mode = #tpu.pipeline_mode<synchronous>, transform_indices = @transform_1, window_bounds = array<i64: 32, 48>}, {pipeline_mode = #tpu.pipeline_mode<synchronous>, transform_indices = @transform_2, window_bounds = array<i64: 16, 16>}, {pipeline_mode = #tpu.pipeline_mode<synchronous>, transform_indices = @transform_3, window_bounds = array<i64: 1, 16>}, {pipeline_mode = #tpu.pipeline_mode<synchronous>, transform_indices = @transform_4, window_bounds = array<i64: 1, 16>}, {transform_indices = @transform_5, window_bounds = array<i64: 1, 2, 8, 8>}, {transform_indices = @transform_6, window_bounds = array<i64: 1, 2, 8, 8>}, {transform_indices = @transform_7, window_bounds = array<i64: 1, 2, 8, 8>}]} {
    %c0 = arith.constant 0 : index
    %c0_0 = arith.constant 0 : index
    %c0_1 = arith.constant 0 : index
    %0 = vector.load %arg2[%c0, %c0_0, %c0_1] : memref<1x8x32xf32, #tpu.memory_space<vmem>>, vector<1x8x32xf32>
    %1 = vector.shape_cast %0 : vector<1x8x32xf32> to vector<8x32xf32>
    %c0_2 = arith.constant 0 : index
    %c0_3 = arith.constant 0 : index
    %2 = vector.load %arg3[%c0_2, %c0_3] : memref<32x48xf32, #tpu.memory_space<vmem>>, vector<32x48xf32>
    %cst = arith.constant dense<0.000000e+00> : vector<8x48xf32>
    %3 = tpu.matmul %1, %2, %cst {dimension_numbers = #tpu.dot_dimension_numbers<[1], [0], [0], [1], [0, 0, 1, 1], [], []>} : vector<8x32xf32>, vector<32x48xf32>, vector<8x48xf32> -> vector<8x48xf32>
    %4 = vector.extract_strided_slice %3 {offsets = [0, 0], sizes = [8, 16], strides = [1, 1]} : vector<8x48xf32> to vector<8x16xf32>
    %5 = vector.extract_strided_slice %3 {offsets = [0, 16], sizes = [8, 16], strides = [1, 1]} : vector<8x48xf32> to vector<8x16xf32>
    %6 = vector.extract_strided_slice %3 {offsets = [0, 32], sizes = [8, 16], strides = [1, 1]} : vector<8x48xf32> to vector<8x16xf32>
    %c0_4 = arith.constant 0 : index
    %c0_5 = arith.constant 0 : index
    %7 = vector.load %arg4[%c0_4, %c0_5] : memref<16x16xf32, #tpu.memory_space<vmem>>, vector<16x16xf32>
    %8 = arith.mulf %4, %4 : vector<8x16xf32>
    %cst_6 = arith.constant dense<0.000000e+00> : vector<8x16xf32>
    %9 = tpu.matmul %8, %7, %cst_6 {dimension_numbers = #tpu.dot_dimension_numbers<[1], [0], [0], [1], [0, 0, 1, 1], [], []>} : vector<8x16xf32>, vector<16x16xf32>, vector<8x16xf32> -> vector<8x16xf32>
    %10 = arith.mulf %5, %5 : vector<8x16xf32>
    %cst_7 = arith.constant dense<0.000000e+00> : vector<8x16xf32>
    %11 = tpu.matmul %10, %7, %cst_7 {dimension_numbers = #tpu.dot_dimension_numbers<[1], [0], [0], [1], [0, 0, 1, 1], [], []>} : vector<8x16xf32>, vector<16x16xf32>, vector<8x16xf32> -> vector<8x16xf32>
    %c0_8 = arith.constant 0 : index
    %c0_9 = arith.constant 0 : index
    %12 = vector.load %arg5[%c0_8, %c0_9] : memref<1x16xf32, #tpu.memory_space<vmem>>, vector<1x16xf32>
    %13 = math.sqrt %9 : vector<8x16xf32>
    %cst_10 = arith.constant 9.99999996E-13 : f32
    %14 = vector.broadcast %cst_10 : f32 to vector<8x16xf32>
    %15 = arith.maximumf %13, %14 : vector<8x16xf32>
    %16 = vector.broadcast %12 : vector<1x16xf32> to vector<8x16xf32>
    %17 = arith.divf %16, %15 : vector<8x16xf32>
    %18 = arith.mulf %4, %17 : vector<8x16xf32>
    %c0_11 = arith.constant 0 : index
    %c0_12 = arith.constant 0 : index
    %19 = vector.load %arg6[%c0_11, %c0_12] : memref<1x16xf32, #tpu.memory_space<vmem>>, vector<1x16xf32>
    %20 = math.sqrt %11 : vector<8x16xf32>
    %cst_13 = arith.constant 9.99999996E-13 : f32
    %21 = vector.broadcast %cst_13 : f32 to vector<8x16xf32>
    %22 = arith.maximumf %20, %21 : vector<8x16xf32>
    %23 = vector.broadcast %19 : vector<1x16xf32> to vector<8x16xf32>
    %24 = arith.divf %23, %22 : vector<8x16xf32>
    %25 = arith.mulf %5, %24 : vector<8x16xf32>
    %26 = vector.extract_strided_slice %18 {offsets = [0, 0], sizes = [8, 8], strides = [1, 1]} : vector<8x16xf32> to vector<8x8xf32>
    %c0_14 = arith.constant 0 : index
    %c0_15 = arith.constant 0 : index
    %c0_16 = arith.constant 0 : index
    %c0_17 = arith.constant 0 : index
    %27 = vector.load %arg7[%c0_14, %c0_15, %c0_16, %c0_17] : memref<1x2x8x8xf32, #tpu.memory_space<vmem>>, vector<1x1x8x8xf32>
    %28 = vector.shape_cast %27 : vector<1x1x8x8xf32> to vector<8x8xf32>
    %29 = vector.shape_cast %26 : vector<8x8xf32> to vector<1x1x8x8xf32>
    tpu.vector_store %arg7[%c0_14, %c0_15, %c0_16, %c0_17], %29 {strides = array<i32>} : memref<1x2x8x8xf32, #tpu.memory_space<vmem>>, vector<1x1x8x8xf32>,
    %30 = vector.extract_strided_slice %6 {offsets = [0, 0], sizes = [8, 8], strides = [1, 1]} : vector<8x16xf32> to vector<8x8xf32>
    %c0_18 = arith.constant 0 : index
    %c0_19 = arith.constant 0 : index
    %c0_20 = arith.constant 0 : index
    %c0_21 = arith.constant 0 : index
    %31 = vector.load %arg9[%c0_18, %c0_19, %c0_20, %c0_21] : memref<1x2x8x8xf32, #tpu.memory_space<vmem>>, vector<1x1x8x8xf32>
    %32 = vector.shape_cast %31 : vector<1x1x8x8xf32> to vector<8x8xf32>
    %33 = vector.shape_cast %30 : vector<8x8xf32> to vector<1x1x8x8xf32>
    tpu.vector_store %arg9[%c0_18, %c0_19, %c0_20, %c0_21], %33 {strides = array<i32>} : memref<1x2x8x8xf32, #tpu.memory_space<vmem>>, vector<1x1x8x8xf32>,
    %34 = vector.extract_strided_slice %25 {offsets = [0, 0], sizes = [8, 8], strides = [1, 1]} : vector<8x16xf32> to vector<8x8xf32>
    %35 = tpu.transpose %34, [1, 0] : vector<8x8xf32> -> vector<8x8xf32>
    %c0_22 = arith.constant 0 : index
    %c0_23 = arith.constant 0 : index
    %c0_24 = arith.constant 0 : index
    %c0_25 = arith.constant 0 : index
    %36 = vector.load %arg8[%c0_22, %c0_23, %c0_24, %c0_25] : memref<1x2x8x8xf32, #tpu.memory_space<vmem>>, vector<1x1x8x8xf32>
    %37 = vector.shape_cast %36 : vector<1x1x8x8xf32> to vector<8x8xf32>
    %38 = vector.shape_cast %35 : vector<8x8xf32> to vector<1x1x8x8xf32>
    tpu.vector_store %arg8[%c0_22, %c0_23, %c0_24, %c0_25], %38 {strides = array<i32>} : memref<1x2x8x8xf32, #tpu.memory_space<vmem>>, vector<1x1x8x8xf32>,
    %39 = vector.extract_strided_slice %18 {offsets = [0, 8], sizes = [8, 8], strides = [1, 1]} : vector<8x16xf32> to vector<8x8xf32>
    %c0_26 = arith.constant 0 : index
    %c1 = arith.constant 1 : index
    %c0_27 = arith.constant 0 : index
    %c0_28 = arith.constant 0 : index
    %40 = vector.load %arg7[%c0_26, %c1, %c0_27, %c0_28] : memref<1x2x8x8xf32, #tpu.memory_space<vmem>>, vector<1x1x8x8xf32>
    %41 = vector.shape_cast %40 : vector<1x1x8x8xf32> to vector<8x8xf32>
    %42 = vector.shape_cast %39 : vector<8x8xf32> to vector<1x1x8x8xf32>
    tpu.vector_store %arg7[%c0_26, %c1, %c0_27, %c0_28], %42 {strides = array<i32>} : memref<1x2x8x8xf32, #tpu.memory_space<vmem>>, vector<1x1x8x8xf32>,
    %43 = vector.extract_strided_slice %6 {offsets = [0, 8], sizes = [8, 8], strides = [1, 1]} : vector<8x16xf32> to vector<8x8xf32>
    %c0_29 = arith.constant 0 : index
    %c1_30 = arith.constant 1 : index
    %c0_31 = arith.constant 0 : index
    %c0_32 = arith.constant 0 : index
    %44 = vector.load %arg9[%c0_29, %c1_30, %c0_31, %c0_32] : memref<1x2x8x8xf32, #tpu.memory_space<vmem>>, vector<1x1x8x8xf32>
    %45 = vector.shape_cast %44 : vector<1x1x8x8xf32> to vector<8x8xf32>
    %46 = vector.shape_cast %43 : vector<8x8xf32> to vector<1x1x8x8xf32>
    tpu.vector_store %arg9[%c0_29, %c1_30, %c0_31, %c0_32], %46 {strides = array<i32>} : memref<1x2x8x8xf32, #tpu.memory_space<vmem>>, vector<1x1x8x8xf32>,
    %47 = vector.extract_strided_slice %25 {offsets = [0, 8], sizes = [8, 8], strides = [1, 1]} : vector<8x16xf32> to vector<8x8xf32>
    %48 = tpu.transpose %47, [1, 0] : vector<8x8xf32> -> vector<8x8xf32>
    %c0_33 = arith.constant 0 : index
    %c1_34 = arith.constant 1 : index
    %c0_35 = arith.constant 0 : index
    %c0_36 = arith.constant 0 : index
    %49 = vector.load %arg8[%c0_33, %c1_34, %c0_35, %c0_36] : memref<1x2x8x8xf32, #tpu.memory_space<vmem>>, vector<1x1x8x8xf32>
    %50 = vector.shape_cast %49 : vector<1x1x8x8xf32> to vector<8x8xf32>
    %51 = vector.shape_cast %48 : vector<8x8xf32> to vector<1x1x8x8xf32>
    tpu.vector_store %arg8[%c0_33, %c1_34, %c0_35, %c0_36], %51 {strides = array<i32>} : memref<1x2x8x8xf32, #tpu.memory_space<vmem>>, vector<1x1x8x8xf32>,
    return
  }
  func.func @transform_0(%arg0: i32, %arg1: i32) -> (i32, i32, i32) {
    %c0_i32 = arith.constant 0 : i32
    %c0_i32_0 = arith.constant 0 : i32
    return %arg0, %arg1, %c0_i32 : i32, i32, i32
  }
  func.func @transform_1(%arg0: i32, %arg1: i32) -> (i32, i32) {
    %c0_i32 = arith.constant 0 : i32
    %c0_i32_0 = arith.constant 0 : i32
    %c0_i32_1 = arith.constant 0 : i32
    return %c0_i32, %c0_i32_0 : i32, i32
  }
  func.func @transform_2(%arg0: i32, %arg1: i32) -> (i32, i32) {
    %c0_i32 = arith.constant 0 : i32
    %c0_i32_0 = arith.constant 0 : i32
    %c0_i32_1 = arith.constant 0 : i32
    return %c0_i32, %c0_i32_0 : i32, i32
  }
  func.func @transform_3(%arg0: i32, %arg1: i32) -> (i32, i32) {
    %c0_i32 = arith.constant 0 : i32
    %c0_i32_0 = arith.constant 0 : i32
    %c0_i32_1 = arith.constant 0 : i32
    return %c0_i32, %c0_i32_0 : i32, i32
  }
  func.func @transform_4(%arg0: i32, %arg1: i32) -> (i32, i32) {
    %c0_i32 = arith.constant 0 : i32
    %c0_i32_0 = arith.constant 0 : i32
    %c0_i32_1 = arith.constant 0 : i32
    return %c0_i32, %c0_i32_0 : i32, i32
  }
  func.func @transform_5(%arg0: i32, %arg1: i32) -> (i32, i32, i32, i32) {
    %c0_i32 = arith.constant 0 : i32
    %c0_i32_0 = arith.constant 0 : i32
    %c0_i32_1 = arith.constant 0 : i32
    return %arg0, %c0_i32, %arg1, %c0_i32_0 : i32, i32, i32, i32
  }
  func.func @transform_6(%arg0: i32, %arg1: i32) -> (i32, i32, i32, i32) {
    %c0_i32 = arith.constant 0 : i32
    %c0_i32_0 = arith.constant 0 : i32
    %c0_i32_1 = arith.constant 0 : i32
    return %arg0, %c0_i32, %c0_i32_0, %arg1 : i32, i32, i32, i32
  }
  func.func @transform_7(%arg0: i32, %arg1: i32) -> (i32, i32, i32, i32) {
    %c0_i32 = arith.constant 0 : i32
    %c0_i32_0 = arith.constant 0 : i32
    %c0_i32_1 = arith.constant 0 : i32
    return %arg0, %c0_i32, %arg1, %c0_i32_0 : i32, i32, i32, i32
  }
}

module attributes {stable_mosaic.version = 11 : i64} {
  func.func @qkv_project_kernel(%arg0: i32, %arg1: i32, %arg2: memref<1x8x32xf32, #tpu.memory_space<vmem>>, %arg3: memref<32x48xf32, #tpu.memory_space<vmem>>, %arg4: memref<16x16xf32, #tpu.memory_space<vmem>>, %arg5: memref<1x16xf32, #tpu.memory_space<vmem>>, %arg6: memref<1x16xf32, #tpu.memory_space<vmem>>, %arg7: memref<1x2x8x8xf32, #tpu.memory_space<vmem>>, %arg8: memref<1x2x8x8xf32, #tpu.memory_space<vmem>>, %arg9: memref<1x2x8x8xf32, #tpu.memory_space<vmem>>) attributes {dimension_semantics = [#tpu.dimension_semantics<parallel>, #tpu.dimension_semantics<parallel>], iteration_bounds = array<i64: 2, 1>, scalar_prefetch = 0 : i64, scratch_operands = 0 : i64, tpu.core_type = #tpu.core_type<tc>, window_params = [{transform_indices = @transform_0, window_bounds = array<i64: 1, 8, 32>}, {pipeline_mode = #tpu.pipeline_mode<synchronous>, transform_indices = @transform_1, window_bounds = array<i64: 32, 48>}, {pipeline_mode = #tpu.pipeline_mode<synchronous>, transform_indices = @transform_2, window_bounds = array<i64: 16, 16>}, {pipeline_mode = #tpu.pipeline_mode<synchronous>, transform_indices = @transform_3, window_bounds = array<i64: 1, 16>}, {pipeline_mode = #tpu.pipeline_mode<synchronous>, transform_indices = @transform_4, window_bounds = array<i64: 1, 16>}, {transform_indices = @transform_5, window_bounds = array<i64: 1, 2, 8, 8>}, {transform_indices = @transform_6, window_bounds = array<i64: 1, 2, 8, 8>}, {transform_indices = @transform_7, window_bounds = array<i64: 1, 2, 8, 8>}]} {
    %c0 = arith.constant 0 : index
    %c0_0 = arith.constant 0 : index
    %c0_1 = arith.constant 0 : index
    %0 = vector.load %arg2[%c0, %c0_0, %c0_1] : memref<1x8x32xf32, #tpu.memory_space<vmem>>, vector<1x8x32xf32>
    %1 = vector.shape_cast %0 : vector<1x8x32xf32> to vector<8x32xf32>
    %c0_2 = arith.constant 0 : index
    %c0_3 = arith.constant 0 : index
    %2 = vector.load %arg3[%c0_2, %c0_3] : memref<32x48xf32, #tpu.memory_space<vmem>>, vector<32x48xf32>
    %cst = arith.constant dense<0.000000e+00> : vector<8x48xf32>
    %3 = tpu.matmul %1, %2, %cst {dimension_numbers = #tpu.dot_dimension_numbers<[1], [0], [0], [1], [0, 0, 1, 1], [], []>} : vector<8x32xf32>, vector<32x48xf32>, vector<8x48xf32> -> vector<8x48xf32>
    %4 = vector.extract_strided_slice %3 {offsets = [0, 0], sizes = [8, 16], strides = [1, 1]} : vector<8x48xf32> to vector<8x16xf32>
    %5 = vector.extract_strided_slice %3 {offsets = [0, 16], sizes = [8, 16], strides = [1, 1]} : vector<8x48xf32> to vector<8x16xf32>
    %6 = vector.extract_strided_slice %3 {offsets = [0, 32], sizes = [8, 16], strides = [1, 1]} : vector<8x48xf32> to vector<8x16xf32>
    %c0_4 = arith.constant 0 : index
    %c0_5 = arith.constant 0 : index
    %7 = vector.load %arg4[%c0_4, %c0_5] : memref<16x16xf32, #tpu.memory_space<vmem>>, vector<16x16xf32>
    %8 = arith.mulf %4, %4 : vector<8x16xf32>
    %cst_6 = arith.constant dense<0.000000e+00> : vector<8x16xf32>
    %9 = tpu.matmul %8, %7, %cst_6 {dimension_numbers = #tpu.dot_dimension_numbers<[1], [0], [0], [1], [0, 0, 1, 1], [], []>} : vector<8x16xf32>, vector<16x16xf32>, vector<8x16xf32> -> vector<8x16xf32>
    %10 = arith.mulf %5, %5 : vector<8x16xf32>
    %cst_7 = arith.constant dense<0.000000e+00> : vector<8x16xf32>
    %11 = tpu.matmul %10, %7, %cst_7 {dimension_numbers = #tpu.dot_dimension_numbers<[1], [0], [0], [1], [0, 0, 1, 1], [], []>} : vector<8x16xf32>, vector<16x16xf32>, vector<8x16xf32> -> vector<8x16xf32>
    %c0_8 = arith.constant 0 : index
    %c0_9 = arith.constant 0 : index
    %12 = vector.load %arg5[%c0_8, %c0_9] : memref<1x16xf32, #tpu.memory_space<vmem>>, vector<1x16xf32>
    %13 = math.sqrt %9 : vector<8x16xf32>
    %cst_10 = arith.constant 9.99999996E-13 : f32
    %14 = vector.broadcast %cst_10 : f32 to vector<8x16xf32>
    %15 = arith.maximumf %13, %14 : vector<8x16xf32>
    %16 = vector.broadcast %12 : vector<1x16xf32> to vector<8x16xf32>
    %17 = arith.divf %16, %15 : vector<8x16xf32>
    %18 = arith.mulf %4, %17 : vector<8x16xf32>
    %c0_11 = arith.constant 0 : index
    %c0_12 = arith.constant 0 : index
    %19 = vector.load %arg6[%c0_11, %c0_12] : memref<1x16xf32, #tpu.memory_space<vmem>>, vector<1x16xf32>
    %20 = math.sqrt %11 : vector<8x16xf32>
    %cst_13 = arith.constant 9.99999996E-13 : f32
    %21 = vector.broadcast %cst_13 : f32 to vector<8x16xf32>
    %22 = arith.maximumf %20, %21 : vector<8x16xf32>
    %23 = vector.broadcast %19 : vector<1x16xf32> to vector<8x16xf32>
    %24 = arith.divf %23, %22 : vector<8x16xf32>
    %25 = arith.mulf %5, %24 : vector<8x16xf32>
    %26 = vector.extract_strided_slice %18 {offsets = [0, 0], sizes = [8, 8], strides = [1, 1]} : vector<8x16xf32> to vector<8x8xf32>
    %c0_14 = arith.constant 0 : index
    %c0_15 = arith.constant 0 : index
    %c0_16 = arith.constant 0 : index
    %c0_17 = arith.constant 0 : index
    %27 = vector.load %arg7[%c0_14, %c0_15, %c0_16, %c0_17] : memref<1x2x8x8xf32, #tpu.memory_space<vmem>>, vector<1x1x8x8xf32>
    %28 = vector.shape_cast %27 : vector<1x1x8x8xf32> to vector<8x8xf32>
    %29 = vector.shape_cast %26 : vector<8x8xf32> to vector<1x1x8x8xf32>
    tpu.vector_store %arg7[%c0_14, %c0_15, %c0_16, %c0_17], %29 {strides = array<i32>} : memref<1x2x8x8xf32, #tpu.memory_space<vmem>>, vector<1x1x8x8xf32>,
    %30 = vector.extract_strided_slice %6 {offsets = [0, 0], sizes = [8, 8], strides = [1, 1]} : vector<8x16xf32> to vector<8x8xf32>
    %c0_18 = arith.constant 0 : index
    %c0_19 = arith.constant 0 : index
    %c0_20 = arith.constant 0 : index
    %c0_21 = arith.constant 0 : index
    %31 = vector.load %arg9[%c0_18, %c0_19, %c0_20, %c0_21] : memref<1x2x8x8xf32, #tpu.memory_space<vmem>>, vector<1x1x8x8xf32>
    %32 = vector.shape_cast %31 : vector<1x1x8x8xf32> to vector<8x8xf32>
    %33 = vector.shape_cast %30 : vector<8x8xf32> to vector<1x1x8x8xf32>
    tpu.vector_store %arg9[%c0_18, %c0_19, %c0_20, %c0_21], %33 {strides = array<i32>} : memref<1x2x8x8xf32, #tpu.memory_space<vmem>>, vector<1x1x8x8xf32>,
    %34 = vector.extract_strided_slice %25 {offsets = [0, 0], sizes = [8, 8], strides = [1, 1]} : vector<8x16xf32> to vector<8x8xf32>
    %35 = tpu.transpose %34, [1, 0] : vector<8x8xf32> -> vector<8x8xf32>
    %c0_22 = arith.constant 0 : index
    %c0_23 = arith.constant 0 : index
    %c0_24 = arith.constant 0 : index
    %c0_25 = arith.constant 0 : index
    %36 = vector.load %arg8[%c0_22, %c0_23, %c0_24, %c0_25] : memref<1x2x8x8xf32, #tpu.memory_space<vmem>>, vector<1x1x8x8xf32>
    %37 = vector.shape_cast %36 : vector<1x1x8x8xf32> to vector<8x8xf32>
    %38 = vector.shape_cast %35 : vector<8x8xf32> to vector<1x1x8x8xf32>
    tpu.vector_store %arg8[%c0_22, %c0_23, %c0_24, %c0_25], %38 {strides = array<i32>} : memref<1x2x8x8xf32, #tpu.memory_space<vmem>>, vector<1x1x8x8xf32>,
    %39 = vector.extract_strided_slice %18 {offsets = [0, 8], sizes = [8, 8], strides = [1, 1]} : vector<8x16xf32> to vector<8x8xf32>
    %c0_26 = arith.constant 0 : index
    %c1 = arith.constant 1 : index
    %c0_27 = arith.constant 0 : index
    %c0_28 = arith.constant 0 : index
    %40 = vector.load %arg7[%c0_26, %c1, %c0_27, %c0_28] : memref<1x2x8x8xf32, #tpu.memory_space<vmem>>, vector<1x1x8x8xf32>
    %41 = vector.shape_cast %40 : vector<1x1x8x8xf32> to vector<8x8xf32>
    %42 = vector.shape_cast %39 : vector<8x8xf32> to vector<1x1x8x8xf32>
    tpu.vector_store %arg7[%c0_26, %c1, %c0_27, %c0_28], %42 {strides = array<i32>} : memref<1x2x8x8xf32, #tpu.memory_space<vmem>>, vector<1x1x8x8xf32>,
    %43 = vector.extract_strided_slice %6 {offsets = [0, 8], sizes = [8, 8], strides = [1, 1]} : vector<8x16xf32> to vector<8x8xf32>
    %c0_29 = arith.constant 0 : index
    %c1_30 = arith.constant 1 : index
    %c0_31 = arith.constant 0 : index
    %c0_32 = arith.constant 0 : index
    %44 = vector.load %arg9[%c0_29, %c1_30, %c0_31, %c0_32] : memref<1x2x8x8xf32, #tpu.memory_space<vmem>>, vector<1x1x8x8xf32>
    %45 = vector.shape_cast %44 : vector<1x1x8x8xf32> to vector<8x8xf32>
    %46 = vector.shape_cast %43 : vector<8x8xf32> to vector<1x1x8x8xf32>
    tpu.vector_store %arg9[%c0_29, %c1_30, %c0_31, %c0_32], %46 {strides = array<i32>} : memref<1x2x8x8xf32, #tpu.memory_space<vmem>>, vector<1x1x8x8xf32>,
    %47 = vector.extract_strided_slice %25 {offsets = [0, 8], sizes = [8, 8], strides = [1, 1]} : vector<8x16xf32> to vector<8x8xf32>
    %48 = tpu.transpose %47, [1, 0] : vector<8x8xf32> -> vector<8x8xf32>
    %c0_33 = arith.constant 0 : index
    %c1_34 = arith.constant 1 : index
    %c0_35 = arith.constant 0 : index
    %c0_36 = arith.constant 0 : index
    %49 = vector.load %arg8[%c0_33, %c1_34, %c0_35, %c0_36] : memref<1x2x8x8xf32, #tpu.memory_space<vmem>>, vector<1x1x8x8xf32>
    %50 = vector.shape_cast %49 : vector<1x1x8x8xf32> to vector<8x8xf32>
    %51 = vector.shape_cast %48 : vector<8x8xf32> to vector<1x1x8x8xf32>
    tpu.vector_store %arg8[%c0_33, %c1_34, %c0_35, %c0_36], %51 {strides = array<i32>} : memref<1x2x8x8xf32, #tpu.memory_space<vmem>>, vector<1x1x8x8xf32>,
    return
  }
  func.func @transform_0(%arg0: i32, %arg1: i32) -> (i32, i32, i32) {
    %c0_i32 = arith.constant 0 : i32
    %c0_i32_0 = arith.constant 0 : i32
    return %arg0, %arg1, %c0_i32 : i32, i32, i32
  }
  func.func @transform_1(%arg0: i32, %arg1: i32) -> (i32, i32) {
    %c0_i32 = arith.constant 0 : i32
    %c0_i32_0 = arith.constant 0 : i32
    %c0_i32_1 = arith.constant 0 : i32
    return %c0_i32, %c0_i32_0 : i32, i32
  }
  func.func @transform_2(%arg0: i32, %arg1: i32) -> (i32, i32) {
    %c0_i32 = arith.constant 0 : i32
    %c0_i32_0 = arith.constant 0 : i32
    %c0_i32_1 = arith.constant 0 : i32
    return %c0_i32, %c0_i32_0 : i32, i32
  }
  func.func @transform_3(%arg0: i32, %arg1: i32) -> (i32, i32) {
    %c0_i32 = arith.constant 0 : i32
    %c0_i32_0 = arith.constant 0 : i32
    %c0_i32_1 = arith.constant 0 : i32
    return %c0_i32, %c0_i32_0 : i32, i32
  }
  func.func @transform_4(%arg0: i32, %arg1: i32) -> (i32, i32) {
    %c0_i32 = arith.constant 0 : i32
    %c0_i32_0 = arith.constant 0 : i32
    %c0_i32_1 = arith.constant 0 : i32
    return %c0_i32, %c0_i32_0 : i32, i32
  }
  func.func @transform_5(%arg0: i32, %arg1: i32) -> (i32, i32, i32, i32) {
    %c0_i32 = arith.constant 0 : i32
    %c0_i32_0 = arith.constant 0 : i32
    %c0_i32_1 = arith.constant 0 : i32
    return %arg0, %c0_i32, %arg1, %c0_i32_0 : i32, i32, i32, i32
  }
  func.func @transform_6(%arg0: i32, %arg1: i32) -> (i32, i32, i32, i32) {
    %c0_i32 = arith.constant 0 : i32
    %c0_i32_0 = arith.constant 0 : i32
    %c0_i32_1 = arith.constant 0 : i32
    return %arg0, %c0_i32, %c0_i32_0, %arg1 : i32, i32, i32, i32
  }
  func.func @transform_7(%arg0: i32, %arg1: i32) -> (i32, i32, i32, i32) {
    %c0_i32 = arith.constant 0 : i32
    %c0_i32_0 = arith.constant 0 : i32
    %c0_i32_1 = arith.constant 0 : i32
    return %arg0, %c0_i32, %arg1, %c0_i32_0 : i32, i32, i32, i32
  }
}

</mosaic_0001>

<bundles_post_ra>
// kernel: tpu_custom_call.1
= control target key start
LH: loop header
LB: loop body
LE: loop exit
PB: predicated region body
PF: predicated region fallthrough
CT: control target
= control target key end

     0   :  { %s1519_s0 = inlined_call_operand.hbm [shape: f32[2,8,32], index: 0, kind: input, shape index: {}]   ;;  %s1520_s1 = inlined_call_operand.hbm [shape: f32[32,48], index: 1, kind: input, shape index: {}]   ;;  %s1521_s2 = inlined_call_operand.hbm [shape: f32[16,16], index: 2, kind: input, shape index: {}]   ;;  %s1522_s3 = inlined_call_operand.vmem [shape: f32[1,16], index: 3, kind: input, shape index: {}]   ;;  %s1523_s4 = inlined_call_operand.vmem [shape: f32[1,16], index: 4, kind: input, shape index: {}]   ;;  %s1524_s5 = inlined_call_operand.hbm [shape: f32[2,2,8,8], index: 5, kind: output, shape index: {0}]   ;;  %s1525_s6 = inlined_call_operand.hbm [shape: f32[2,2,8,8], index: 6, kind: output, shape index: {1}]   ;;  %s1526_s7 = inlined_call_operand.hbm [shape: f32[2,2,8,8], index: 7, kind: output, shape index: {2}]  }
   0x1   :  { %1528 = sst [smem:[#allocation16_spill]] %s1519_s0 }
   0x2   :  { %1529 = sst [smem:[#allocation17_spill]] %s1520_s1 }
   0x3   :  { %1530 = sst [smem:[#allocation18_spill]] %s1521_s2 }
   0x4   :  { %1531 = sst [smem:[#allocation19_spill]] %s1522_s3 }
   0x5   :  { %1532 = sst [smem:[#allocation20_spill]] %s1523_s4 }
   0x6   :  { %1533 = sst [smem:[#allocation21_spill]] %s1524_s5 }
   0x7   :  { %13 = vsyncpa [#allocation3], 0 }
   0x8   :  { %15 = vsyncpa [#allocation3 + $0x1], 0 }
   0x9   :  { %16 = vsyncpa [#allocation6], 0 }
   0xa   :  { %17 = vsyncpa [#allocation4], 0 }
   0xb   :  { %19 = vsyncpa [#allocation4 + $0x1], 0 }
   0xc   :  { %20 = vsyncpa [#allocation10], 0 }
   0xd   :  { %22 = vsyncpa [#allocation10 + $0x1], 0  ;;  %s1282_s24 = smov 0   ;;  %s1284_s25 = smov 0  }
   0xe   :  { %s1286_s26 = smov 0   ;;  %s1288_s27 = smov 0  }
   0xf   :  { %s1290_s28 = smov 0   ;;  %s1292_s29 = smov 0  }
  0x10 LB: > { %s1313_s30 = sadd.s32 4294967295, %s1228_s29   ;;  %p845_p0 = scmp.ge.s32.totalorder %s1228_s29, 1  ;;  %s1228_s29 = sphi %s1292_s29, %s28_s29   ;;  %s1224_s28 = sphi %s1290_s28, %s1549_s28   ;;  %s1220_s27 = sphi %s1288_s27, %s1548_s27   ;;  %s1216_s26 = sphi %s1286_s26, %s1547_s26   ;;  %s1212_s25 = sphi %s1284_s25, %s1546_s25   ;;  %s1208_s24 = sphi %s1282_s24, %s1545_s24  }
  0x11   : > { %p63_p1 = scmp.eq.s32.totalorder %s1313_s30, 0  ;;  %p241_p2 = scmp.lt.s32.totalorder %s1228_s29, 3 }
  0x12   : > { %s1534_s1 = sld [smem:[#allocation17_spill]]  ;;  %s1230_s12 = smov [#allocation5]  }
  0x13   : > { %p1321_p3 = pnand %p845_p0, %p241_p2  ;;  %s254_s13 = sshll.u32 %s1230_s12, 4  ;;  %s255_s13 = int_to_ptr.vmem [resolvable:$true] %s254_s13 }
  0x14   : > { %p848_p6 = scmp.ge.s32.totalorder %s1228_s29, 2  ;;  %s1536_s2 = sld [smem:[#allocation18_spill]] }
  0x15   : > { %p894_p4 = pneg %p1321_p3  ;;  %s1231_s17 = smov 128  }
  0x16   : > { %s1232_s18 = smov 8   ;;  %s1233_s19 = smov [#allocation7]  }
  0x17   : > { %p895_p5 = pnand %p894_p4, %p63_p1  ;;  %s268_s20 = sshll.u32 %s1233_s19, 4  ;;  %s269_s20 = int_to_ptr.vmem [resolvable:$true] %s268_s20 }
  0x18   : > { %s252_s10 = sshll.u32 %s1534_s1, 4  ;;  %s40_s21 = sadd.s32 1, %s1224_s28  ;;  %s253_s10 = int_to_ptr.hbm [resolvable:$true] %s252_s10 }
  0x19   : > { %897 = dma.hbm_to_vmem [thread:$0]  (!%p895_p5), %s253_s10, 512, %s255_s13, [#allocation6], %s1231_s17, %s1231_s17, %s1232_s18  }
  0x1a   : > { %s266_s16 = sshll.u32 %s1536_s2, 4  ;;  %s1527_s22 = sadd.s32 4294967294, %s1228_s29   ;;  %s267_s16 = int_to_ptr.hbm [resolvable:$true] %s266_s16 }
  0x1b   : > { %900 = dma.hbm_to_vmem [thread:$0]  (!%p895_p5), %s267_s16, 256, %s269_s20, [#allocation6], %s1231_s17, %s1231_s17, %s1232_s18  }
  0x1c   : > { %p42_p7 = scmp.ge.s32.totalorder %s40_s21, 2  ;;  %s49_s23 = sadd.s32 1, %s1216_s26 }
  0x1d   : > { %p56_p8 = scmp.ne.s32.totalorder %s1216_s26, %s1212_s25  ;;  %p57_p9 = scmp.eq.s32.totalorder %s1228_s29, 0 }
  0x1e   : > { %s1551_s21 = smov (%p42_p7, %s40_s21), 0  ;;  %p62_p10 = scmp.ne.s32.totalorder %s1212_s25, %s1208_s24 }
  0x1f   : > { %s44_s8 = ssub.s32 %s1224_s28, %s1551_s21  ;;  %p172_p11 = scmp.eq.s32.totalorder %s1313_s30, 1 }
  0x20   : > { %p47_p12 = scmp.eq.s32.totalorder %s44_s8, 0  ;;  %p1348_p13 = por %p63_p1, %p62_p10 }
  0x21   : > { %p1352_p0 = por %p172_p11, %p56_p8  ;;  %p178_p2 = scmp.eq.s32.totalorder %s1527_s22, 1 }
  0x22   : > { %s1359_s12 = scalar_select %p47_p12, %s1216_s26, %s49_s23  }
  0x23   : > { %p58_p4 = por %p57_p9, %p56_p8  ;;  %p1361_p5 = por %p178_p2, %p62_p10 }
  0x24   : > { %s288_s14 = sand.u32 1, %s1216_s26   ;;  %s850_s15 = sshll.u32 %s1224_s28, 3 }
  0x25   : > { %p917_p7 = scmp.lt.s32.totalorder %s1228_s29, 2  ;;  %s849_s16 = sshll.u32 %s288_s14, 3 }
  0x26   : > { %s1540_s0 = sld [smem:[#allocation16_spill]]  ;;  %s292_s8 = scalar_lea.vmem [#allocation2], %s849_s16 }
  0x27   : > { %s301_s1 = sshll.u32 %s292_s8, 4  ;;  %p902_p11 = pnand %p917_p7, %p58_p4  ;;  %s302_s1 = int_to_ptr.vmem [resolvable:$true] %s301_s1 }
  0x28   : > { %s289_s23 = scalar_lea.sflag [#allocation3], %s288_s14  ;;  %s1374_s22 = sand.u32 (!%p1321_p3), 1, %s1212_s25  }
  0x29   : > { %s852_s2 = sshll.u32 (!%p1321_p3), %s1374_s22, 3  ;;  %s313_s17 = scalar_lea.sflag (!%p1321_p3), [#allocation3], %s1374_s22 }
  0x2a   : > { %310 = sbr.rel (%p1321_p3) target bundleno = 1083 (0x43b), region = 40 }
  0x2c   : > { %s297_s19 = scalar_lea.hbm %s1540_s0, %s850_s15  ;;  %s316_s15 = scalar_lea.vmem (!%p1321_p3), [#allocation2], %s852_s2 }
  0x2d   : > { %s299_s20 = sshll.u32 %s297_s19, 4  ;;  %s300_s20 = int_to_ptr.hbm [resolvable:$true] %s299_s20 }
  0x2e   : > { %904 = dma.hbm_to_vmem [thread:$0]  (!%p902_p11), %s300_s20, 128, %s302_s1, %s289_s23  }
  0x2f   : > { %1191 = dma.done.wait (%p1348_p13), %s313_s17, 128  }
  0x30   : > { %1193 = vsyncadd (%p1348_p13), %s313_s17, 4294967168 }
  0x31   : > { %1195 = dma.done.wait (%p63_p1), [#allocation6], 768  }
  0x32   : > { %1197 = vsyncadd (%p63_p1), [#allocation6], 4294966528  ;;  %v372_v0 = vld [vmem:[#allocation5 + $0x18] sm:$0xff]  ;;  %v371_v1 = vld [vmem:[#allocation5 + $0x10] sm:$0xff]  ;;  %vm373_vm0 = vcmask 261120   ;;  %vm400_vm1 = vcmask 130048  }
  0x33   : > { %389 = vmatpush.msra.mxu0 %v372_v0  ;;  %v370_v2 = vld [vmem:[#allocation5 + $0x8] sm:$0xff]  ;;  %v369_v3 = vld [vmem:[#allocation5] sm:$0xff]  ;;  %v368_v4 = vld [vmem:[%s316_s15] sm:$0xff]  ;;  %s1234_s1 = smov 96   ;;  %s1235_s2 = smov 112   ;;  %vm518_vm2 = vcmask 64512  }
  0x34   : > { %v398_v5 = vld [vmem:[#allocation7 + $0x8] sm:$0xff]  ;;  %v397_v6 = vld [vmem:[#allocation7] sm:$0xff]  ;;  %s1393_s11 = sshll.u32 %s1374_s22, 4  ;;  %s1541_s3 = sld [smem:[#allocation19_spill]] }
  0x35   : > { %390 = vmatpush.msra.mxu0 %v371_v1  ;;  %418 = vmatpush.msra.mxu1 %v398_v5  ;;  %s1396_s9 = scalar_lea.vmem [#allocation11], %s1393_s11  ;;  %s1405_s18 = scalar_lea.vmem [#allocation8], %s1393_s11 }
  0x36   : > { %442 = vmatpush.msra.mxu2 %v398_v5  ;;  %s1542_s4 = sld [smem:[#allocation20_spill]]  ;;  %s1236_s8 = smov 16  }
  0x37   : > { %391 = vmatpush.msra.mxu0 %v370_v2  ;;  %419 = vmatpush.msra.mxu1 %v397_v6  ;;  %s1237_s23 = smov 120   ;;  %s1238_s17 = smov 88  }
  0x38   : > { %443 = vmatpush.msra.mxu2 %v397_v6  ;;  %s1239_s15 = smov 104   ;;  %s875_s14 = sshll.u32 %s1220_s27, 4 }
  0x39   : > { %392 = vmatpush.msra.mxu0 %v369_v3  ;;  %s1543_s5 = sld [smem:[#allocation21_spill]] }
  0x3a   : > { %858 = vmatmul.msk.f32.vlgmr.msra.gmra.mxu0 %vm373_vm0, %v368_v4  ;;  %v983_v29 = vld [vmem:[%s1541_s3] ss:$0 sm:$0xff] }
  0x3c   : > { %v982_v54 = vld [vmem:[%s1542_s4] ss:$0 sm:$0xff] }
  0x3f   : > { %s633_s20 = scalar_lea.hbm %s1543_s5, %s875_s14 }
  0xb7   : > { %v1386_v7 = vpop.f32.mrf.mxu0 }
  0xb8   : > { %521 = vrot.lane.b32.xlu1 %v1386_v7, %s1234_s1  ;;  %v399_v8 = vmul.f32 %v1386_v7, %v1386_v7  ;;  %s1420_s1 = scalar_lea.vmem [#allocation9], %s1393_s11 }
  0xba   : > { %424 = vrot.lane.b32.xlu0 %v399_v8, %s1235_s2  ;;  %859 = vmatmul.msk.f32.vlgmr.msra.gmra.mxu1 %vm400_vm1, %v399_v8 }
 0x12a   : > { %v522_v9 = vpop.permute.xlu1 %521 }
 0x12b   : > { %524 = vst.msk [vmem:[%s1396_s9] sm:$0xff] %vm518_vm2, %v522_v9 }
 0x12c   : > { %v425_v10 = vpop.permute.xlu0 %424 }
 0x12d   : > { %860 = vmatmul.msk.f32.vlgmr.msra.gmra.mxu2 %vm400_vm1, %v425_v10 }
 0x137   : > { %v421_v11 = vpop.f32.mrf.mxu1 }
 0x138   : > { %984 = vrsqrt.f32 %v421_v11  ;;  %vm456_vm3 = vcmp.eq.f32.partialorder %v421_v11, inf  ;;  %v459_v19 = vand.u32 2147483648, %v421_v11  ;;  %vm458_vm4 = vcmp.eq.f32.partialorder %v421_v11, 0.0 }
 0x13e   : > { %v985_v12 = vpop.eup %984 }
 0x13f   : > { %v450_v13 = vmul.f32 %v985_v12, %v421_v11 }
 0x141   : > { %v451_v14 = vmul.f32 %v985_v12, %v450_v13 }
 0x143   : > { %v452_v15 = vmul.f32 0.5, %v451_v14 }
 0x145   : > { %v453_v16 = vsub.f32 1.5, %v452_v15 }
 0x147   : > { %v454_v17 = vmul.f32 %v985_v12, %v453_v16 }
 0x149   : > { %v455_v18 = vmul.f32 %v454_v17, %v421_v11 }
 0x14b   : > { %v457_v20 = vsel %vm456_vm3, %v421_v11, %v455_v18 }
 0x14c   : > { %v460_v21 = vsel %vm458_vm4, %v459_v19, %v457_v20 }
 0x14d   : > { %v461_v22 = vmax.f32 %v460_v21, 1e-12 }
 0x14f   : > { %986 = vrcp.f32 %v461_v22  ;;  %v476_v26 = vand.u32 2147483648, %v461_v22  ;;  %v474_v28 = vand.u32 2147483647, %v461_v22  ;;  %vm470_vm6 = vweird.f32 %v461_v22 }
 0x151   : > { %v477_v31 = vor.u32 1.1754944e-38, %v476_v26  ;;  %vm475_vm8 = vcmp.eq.f32.partialorder %v474_v28, 8.507059e+37 }
 0x155   : > { %v987_v23 = vpop.eup %986 }
 0x156   : > { %v466_v24 = vmul.f32 %v987_v23, %v461_v22  ;;  %vm471_vm5 = vweird.f32 %v987_v23 }
 0x157   : > { %vm472_vm7 = vmor %vm470_vm6, %vm471_vm5 }
 0x158   : > { %v467_v25 = vsub.f32 1.0, %v466_v24 }
 0x15a   : > { %v468_v27 = vmul.f32 %v987_v23, %v467_v25 }
 0x15c   : > { %v469_v30 = vadd.f32 %v987_v23, %v468_v27 }
 0x15e   : > { %v473_v32 = vsel %vm472_vm7, %v987_v23, %v469_v30 }
 0x15f   : > { %v478_v33 = vsel %vm475_vm8, %v477_v31, %v473_v32 }
 0x160   : > { %v479_v34 = vmul.f32 %v983_v29, %v478_v33 }
 0x162   : > { %v480_v35 = vmul.f32 %v479_v34, %v1386_v7 }
 0x164   : > { %519 = vst.msk [vmem:[%s1405_s18] sm:$0xff] %vm518_vm2, %v480_v35 }
 0x1b0   : > { %v445_v36 = vpop.f32.mrf.mxu2 }
 0x1b1   : > { %988 = vrsqrt.f32 %v445_v36  ;;  %vm489_vm9 = vcmp.eq.f32.partialorder %v445_v36, inf  ;;  %v492_v44 = vand.u32 2147483648, %v445_v36  ;;  %vm491_vm10 = vcmp.eq.f32.partialorder %v445_v36, 0.0 }
 0x1b7   : > { %v989_v37 = vpop.eup %988 }
 0x1b8   : > { %v483_v38 = vmul.f32 %v989_v37, %v445_v36 }
 0x1ba   : > { %v484_v39 = vmul.f32 %v989_v37, %v483_v38 }
 0x1bc   : > { %v485_v40 = vmul.f32 0.5, %v484_v39 }
 0x1be   : > { %v486_v41 = vsub.f32 1.5, %v485_v40 }
 0x1c0   : > { %v487_v42 = vmul.f32 %v989_v37, %v486_v41 }
 0x1c2   : > { %v488_v43 = vmul.f32 %v487_v42, %v445_v36 }
 0x1c4   : > { %v490_v45 = vsel %vm489_vm9, %v445_v36, %v488_v43 }
 0x1c5   : > { %v493_v46 = vsel %vm491_vm10, %v492_v44, %v490_v45 }
 0x1c6   : > { %v494_v47 = vmax.f32 %v493_v46, 1e-12 }
 0x1c8   : > { %990 = vrcp.f32 %v494_v47  ;;  %v509_v51 = vand.u32 2147483648, %v494_v47  ;;  %v507_v53 = vand.u32 2147483647, %v494_v47  ;;  %vm503_vm12 = vweird.f32 %v494_v47 }
 0x1ca   : > { %v510_v56 = vor.u32 1.1754944e-38, %v509_v51  ;;  %vm508_vm14 = vcmp.eq.f32.partialorder %v507_v53, 8.507059e+37 }
 0x1ce   : > { %v991_v48 = vpop.eup %990 }
 0x1cf   : > { %v499_v49 = vmul.f32 %v991_v48, %v494_v47  ;;  %vm504_vm11 = vweird.f32 %v991_v48 }
 0x1d0   : > { %vm505_vm13 = vmor %vm503_vm12, %vm504_vm11 }
 0x1d1   : > { %v500_v50 = vsub.f32 1.0, %v499_v49 }
 0x1d3   : > { %v501_v52 = vmul.f32 %v991_v48, %v500_v50 }
 0x1d5   : > { %v502_v55 = vadd.f32 %v991_v48, %v501_v52 }
 0x1d7   : > { %v506_v57 = vsel %vm505_vm13, %v991_v48, %v502_v55 }
 0x1d8   : > { %v511_v58 = vsel %vm508_vm14, %v510_v56, %v506_v57 }
 0x1d9   : > { %v512_v59 = vmul.f32 %v982_v54, %v511_v58 }
 0x1db   : > { %514 = vrot.lane.b32.xlu0 %v512_v59, %s1236_s8  ;;  %s636_s8 = sshll.u32 %s633_s20, 4  ;;  %s637_s8 = int_to_ptr.hbm [resolvable:$true] %s636_s8 }
 0x1e3   : > { %563 = vrot.lane.b32.xlu0 %v480_v35, %s1237_s23  ;;  %s611_s23 = scalar_lea.sflag [#allocation4], %s1374_s22 }
 0x24d   : > { %v515_v60 = vpop.permute.xlu0 %514 }
 0x24e   : > { %v517_v61 = vmul.f32 %v515_v60, %v1386_v7 }
 0x250   : > { %526 = vrot.lane.b32.xlu1 %v517_v61, %s1235_s2  ;;  %s634_s2 = sshll.u32 %s1405_s18, 4  ;;  %s635_s2 = int_to_ptr.vmem [resolvable:$true] %s634_s2 }
 0x255   : > { %v564_v62 = vpop.permute.xlu0 %563 }
 0x256   : > { %861 = vst.msk [vmem:[%s1405_s18 + $0x8] sm:$0xff] %vm518_vm2, %v564_v62  ;;  %s1102_s18 = scalar_lea.hbm %s1543_s5, 32 }
 0x258   : > { %568 = vrot.lane.b32.xlu1 %v1386_v7, %s1238_s17  ;;  %s1096_s17 = sshra.s32 %s637_s8, 4  ;;  %s1097_s17 = int_to_ptr.hbm [resolvable:$true] %s1096_s17 }
 0x259   : > { %p1103_p9 = scmp.lt.s32.totalorder %s1097_s17, %s1543_s5 }
 0x2c2   : > { %v527_v63 = vpop.permute.xlu1 %526 }
 0x2c3   : > { %529 = vxpose.xlu2.b32.start.end [1/1] (short) (narrow) %v527_v63, 8 }
 0x2ca   : > { %v569_v0 = vpop.permute.xlu1 %568 }
 0x2cb   : > { %862 = vst.msk [vmem:[%s1396_s9 + $0x8] sm:$0xff] %vm518_vm2, %v569_v0 }
 0x32c   : > { %573 = vrot.lane.b32.xlu2 %v517_v61, %s1239_s15  ;;  %s1098_s15 = scalar_lea.hbm %s1097_s17, 16 }
 0x32d   : > { %p1099_p1 = scmp.ne.s32.totalorder %s1097_s17, %s1098_s15  ;;  %p1104_p10 = scmp.lt.s32.totalorder %s1102_s18, %s1098_s15 }
 0x32f   : > { %p1100_p3 = pnand %p1099_p1, %p1352_p0  ;;  %p1105_p12 = por %p1104_p10, %p1103_p9 }
 0x331   : > { %p1101_p8 = pneg %p1100_p3 }
 0x333   : > { %p1106_p13 = pnand %p1105_p12, %p1101_p8 }
 0x35c   : > { %v545_v1 = vpop.trf.xlu2 }
 0x35d   : > { %561 = vst.msk [vmem:[%s1420_s1] sm:$0xff] %vm518_vm2, %v545_v1 }
 0x386   : > { %v574_v2 = vpop.permute.xlu2 %573 }
 0x387   : > { %576 = vxpose.xlu0.b32.start.end [1/1] (short) (narrow) %v574_v2, 8 }
 0x388   : > { %1109 = shalt.err (!%p1106_p13)
}
 0x389   : > { %s1240_s22 = smov 128   ;;  %s1241_s16 = smov 8  }
 0x38a   : > { %888 = dma.vmem_to_hbm [thread:$0]  (%p1352_p0), %s635_s2, 256, %s637_s8, %s611_s23, %s1240_s22, %s1240_s22, %s1241_s16  }
 0x38b   : > { %s651_s3 = scalar_lea.hbm %s1525_s6, %s875_s14  ;;  %s669_s15 = scalar_lea.hbm %s1526_s7, %s875_s14 }
 0x38c   : > { %s652_s11 = sshll.u32 %s1420_s1, 4  ;;  %s615_s18 = sand.u32 1, %s1313_s30   ;;  %s653_s11 = int_to_ptr.vmem [resolvable:$true] %s652_s11 }
 0x38d   : > { %s654_s27 = sshll.u32 %s651_s3, 4  ;;  %s670_s4 = sshll.u32 %s1396_s9, 4  ;;  %s655_s27 = int_to_ptr.hbm [resolvable:$true] %s654_s27  ;;  %s1454_s4 = int_to_ptr.vmem [resolvable:$true] %s670_s4 }
 0x38e   : > { %s1452_s5 = sshll.u32 %s669_s15, 4  ;;  %s1459_s2 = scalar_lea.sflag [#allocation10], %s615_s18  ;;  %s673_s5 = int_to_ptr.hbm [resolvable:$true] %s1452_s5 }
 0x38f   : > { %s1124_s8 = sshra.s32 %s655_s27, 4  ;;  %s1130_s23 = scalar_lea.hbm %s1525_s6, 32  ;;  %s1125_s8 = int_to_ptr.hbm [resolvable:$true] %s1124_s8 }
 0x390   : > { %s1126_s14 = scalar_lea.hbm %s1125_s8, 16  ;;  %p1131_p11 = scmp.lt.s32.totalorder %s1125_s8, %s1525_s6 }
 0x391   : > { %p1127_p2 = scmp.ne.s32.totalorder %s1125_s8, %s1126_s14  ;;  %p1132_p1 = scmp.lt.s32.totalorder %s1130_s23, %s1126_s14 }
 0x393   : > { %p1128_p4 = pnand %p1127_p2, %p1352_p0  ;;  %p1133_p3 = por %p1132_p1, %p1131_p11 }
 0x395   : > { %p1129_p7 = pneg %p1128_p4 }
 0x397   : > { %p1134_p8 = pnand %p1133_p3, %p1129_p7 }
 0x42b   : > { %v592_v3 = vpop.trf.xlu0 }
 0x42c   : > { %863 = vst.msk [vmem:[%s1420_s1 + $0x8] sm:$0xff] %vm518_vm2, %v592_v3 }
 0x42d   : > { %1137 = shalt.err (!%p1134_p8)
}
 0x42e   : > { %889 = dma.vmem_to_hbm [thread:$0]  (%p1352_p0), %s653_s11, 256, %s655_s27, %s1459_s2, %s1240_s22, %s1240_s22, %s1241_s16  }
 0x42f   : > { %s1152_s1 = sshra.s32 %s673_s5, 4  ;;  %s1158_s15 = scalar_lea.hbm %s1526_s7, 32  ;;  %s1153_s1 = int_to_ptr.hbm [resolvable:$true] %s1152_s1 }
 0x430   : > { %s1154_s3 = scalar_lea.hbm %s1153_s1, 16  ;;  %p1159_p13 = scmp.lt.s32.totalorder %s1153_s1, %s1526_s7 }
 0x431   : > { %p1155_p9 = scmp.ne.s32.totalorder %s1153_s1, %s1154_s3  ;;  %p1160_p2 = scmp.lt.s32.totalorder %s1158_s15, %s1154_s3 }
 0x433   : > { %p1156_p10 = pnand %p1155_p9, %p1352_p0  ;;  %p1161_p4 = por %p1160_p2, %p1159_p13 }
 0x435   : > { %p1157_p12 = pneg %p1156_p10 }
 0x437   : > { %p1162_p7 = pnand %p1161_p4, %p1157_p12 }
 0x439   : > { %1165 = shalt.err (!%p1162_p7)
}
 0x43a   : > { %890 = dma.vmem_to_hbm [thread:$0]  (%p1352_p0), %s1454_s4, 256, %s673_s5, %s1459_s2, %s1240_s22, %s1240_s22, %s1241_s16  }
 0x43b PF: > { %s687_s11 = sand.u32 1, %s1208_s24   ;;  %p906_p11 = pnand %p848_p6, %p1361_p5 }
 0x43c   : > { %s688_s27 = scalar_lea.sflag [#allocation4], %s687_s11 }
 0x43d   : > { %p907_p1 = pneg %p906_p11 }
 0x43f   : > { %1199 = dma.done.wait (%p907_p1), %s688_s27, 256  }
 0x440   : > { %1201 = vsyncadd (%p907_p1), %s688_s27, 4294967040  ;;  %s1544_s10 = sadd.s32 4294967294, %s1228_s29  }
 0x441   : > { %s697_s14 = sand.u32 1, %s1544_s10  }
 0x442   : > { %s698_s30 = scalar_lea.sflag [#allocation10], %s697_s14 }
 0x443   : > { %1203 = dma.done.wait (%p907_p1), %s698_s30, 512  }
 0x444   : > { %1205 = vsyncadd (%p907_p1), %s698_s30, 4294966784  ;;  %s28_s29 = sadd.s32 1, %s1228_s29   ;;  %s1545_s24 = smov %s1212_s25 }
 0x445   : > { %p25_p0 = scmp.ge.s32.totalorder %s28_s29, 4   ;;  %s1546_s25 = smov %s1216_s26 }
 0x446   : > { %s1547_s26 = smov %s1359_s12  ;;  %s1548_s27 = smov %s1224_s28 }
 0x447   : > { %s1549_s28 = smov %s1551_s21  ;;  %27 = sbr.rel (!%p25_p0) target bundleno = 16 (0x10), region = 128 }
 0x44c   :  { %714 = vsyncpa [#allocation3], 1 }
 0x44d   :  { %716 = vsyncpa [#allocation3 + $0x1], 1 }
 0x44e   :  { %717 = vsyncpa [#allocation6], 1 }
 0x44f   :  { %718 = vsyncpa [#allocation4], 1 }
 0x450   :  { %720 = vsyncpa [#allocation4 + $0x1], 1 }
 0x451   :  { %721 = vsyncpa [#allocation10], 1 }
 0x452   :  { %723 = vsyncpa [#allocation10 + $0x1], 1 }

// kernel: tpu_custom_call.1
= control target key start
LH: loop header
LB: loop body
LE: loop exit
PB: predicated region body
PF: predicated region fallthrough
CT: control target
= control target key end

     0   :  { %s1519_s0 = inlined_call_operand.hbm [shape: f32[2,8,32], index: 0, kind: input, shape index: {}]   ;;  %s1520_s1 = inlined_call_operand.hbm [shape: f32[32,48], index: 1, kind: input, shape index: {}]   ;;  %s1521_s2 = inlined_call_operand.hbm [shape: f32[16,16], index: 2, kind: input, shape index: {}]   ;;  %s1522_s3 = inlined_call_operand.vmem [shape: f32[1,16], index: 3, kind: input, shape index: {}]   ;;  %s1523_s4 = inlined_call_operand.vmem [shape: f32[1,16], index: 4, kind: input, shape index: {}]   ;;  %s1524_s5 = inlined_call_operand.hbm [shape: f32[2,2,8,8], index: 5, kind: output, shape index: {0}]   ;;  %s1525_s6 = inlined_call_operand.hbm [shape: f32[2,2,8,8], index: 6, kind: output, shape index: {1}]   ;;  %s1526_s7 = inlined_call_operand.hbm [shape: f32[2,2,8,8], index: 7, kind: output, shape index: {2}]  }
   0x1   :  { %1528 = sst [smem:[#allocation16_spill]] %s1519_s0 }
   0x2   :  { %1529 = sst [smem:[#allocation17_spill]] %s1520_s1 }
   0x3   :  { %1530 = sst [smem:[#allocation18_spill]] %s1521_s2 }
   0x4   :  { %1531 = sst [smem:[#allocation19_spill]] %s1522_s3 }
   0x5   :  { %1532 = sst [smem:[#allocation20_spill]] %s1523_s4 }
   0x6   :  { %1533 = sst [smem:[#allocation21_spill]] %s1524_s5 }
   0x7   :  { %13 = vsyncpa [#allocation3], 0 }
   0x8   :  { %15 = vsyncpa [#allocation3 + $0x1], 0 }
   0x9   :  { %16 = vsyncpa [#allocation6], 0 }
   0xa   :  { %17 = vsyncpa [#allocation4], 0 }
   0xb   :  { %19 = vsyncpa [#allocation4 + $0x1], 0 }
   0xc   :  { %20 = vsyncpa [#allocation10], 0 }
   0xd   :  { %22 = vsyncpa [#allocation10 + $0x1], 0  ;;  %s1282_s24 = smov 0   ;;  %s1284_s25 = smov 0  }
   0xe   :  { %s1286_s26 = smov 0   ;;  %s1288_s27 = smov 0  }
   0xf   :  { %s1290_s28 = smov 0   ;;  %s1292_s29 = smov 0  }
  0x10 LB: > { %s1313_s30 = sadd.s32 4294967295, %s1228_s29   ;;  %p845_p0 = scmp.ge.s32.totalorder %s1228_s29, 1  ;;  %s1228_s29 = sphi %s1292_s29, %s28_s29   ;;  %s1224_s28 = sphi %s1290_s28, %s1549_s28   ;;  %s1220_s27 = sphi %s1288_s27, %s1548_s27   ;;  %s1216_s26 = sphi %s1286_s26, %s1547_s26   ;;  %s1212_s25 = sphi %s1284_s25, %s1546_s25   ;;  %s1208_s24 = sphi %s1282_s24, %s1545_s24  }
  0x11   : > { %p63_p1 = scmp.eq.s32.totalorder %s1313_s30, 0  ;;  %p241_p2 = scmp.lt.s32.totalorder %s1228_s29, 3 }
  0x12   : > { %s1534_s1 = sld [smem:[#allocation17_spill]]  ;;  %s1230_s12 = smov [#allocation5]  }
  0x13   : > { %p1321_p3 = pnand %p845_p0, %p241_p2  ;;  %s254_s13 = sshll.u32 %s1230_s12, 4  ;;  %s255_s13 = int_to_ptr.vmem [resolvable:$true] %s254_s13 }
  0x14   : > { %p848_p6 = scmp.ge.s32.totalorder %s1228_s29, 2  ;;  %s1536_s2 = sld [smem:[#allocation18_spill]] }
  0x15   : > { %p894_p4 = pneg %p1321_p3  ;;  %s1231_s17 = smov 128  }
  0x16   : > { %s1232_s18 = smov 8   ;;  %s1233_s19 = smov [#allocation7]  }
  0x17   : > { %p895_p5 = pnand %p894_p4, %p63_p1  ;;  %s268_s20 = sshll.u32 %s1233_s19, 4  ;;  %s269_s20 = int_to_ptr.vmem [resolvable:$true] %s268_s20 }
  0x18   : > { %s252_s10 = sshll.u32 %s1534_s1, 4  ;;  %s40_s21 = sadd.s32 1, %s1224_s28  ;;  %s253_s10 = int_to_ptr.hbm [resolvable:$true] %s252_s10 }
  0x19   : > { %897 = dma.hbm_to_vmem [thread:$0]  (!%p895_p5), %s253_s10, 512, %s255_s13, [#allocation6], %s1231_s17, %s1231_s17, %s1232_s18  }
  0x1a   : > { %s266_s16 = sshll.u32 %s1536_s2, 4  ;;  %s1527_s22 = sadd.s32 4294967294, %s1228_s29   ;;  %s267_s16 = int_to_ptr.hbm [resolvable:$true] %s266_s16 }
  0x1b   : > { %900 = dma.hbm_to_vmem [thread:$0]  (!%p895_p5), %s267_s16, 256, %s269_s20, [#allocation6], %s1231_s17, %s1231_s17, %s1232_s18  }
  0x1c   : > { %p42_p7 = scmp.ge.s32.totalorder %s40_s21, 2  ;;  %s49_s23 = sadd.s32 1, %s1216_s26 }
  0x1d   : > { %p56_p8 = scmp.ne.s32.totalorder %s1216_s26, %s1212_s25  ;;  %p57_p9 = scmp.eq.s32.totalorder %s1228_s29, 0 }
  0x1e   : > { %s1551_s21 = smov (%p42_p7, %s40_s21), 0  ;;  %p62_p10 = scmp.ne.s32.totalorder %s1212_s25, %s1208_s24 }
  0x1f   : > { %s44_s8 = ssub.s32 %s1224_s28, %s1551_s21  ;;  %p172_p11 = scmp.eq.s32.totalorder %s1313_s30, 1 }
  0x20   : > { %p47_p12 = scmp.eq.s32.totalorder %s44_s8, 0  ;;  %p1348_p13 = por %p63_p1, %p62_p10 }
  0x21   : > { %p1352_p0 = por %p172_p11, %p56_p8  ;;  %p178_p2 = scmp.eq.s32.totalorder %s1527_s22, 1 }
  0x22   : > { %s1359_s12 = scalar_select %p47_p12, %s1216_s26, %s49_s23  }
  0x23   : > { %p58_p4 = por %p57_p9, %p56_p8  ;;  %p1361_p5 = por %p178_p2, %p62_p10 }
  0x24   : > { %s288_s14 = sand.u32 1, %s1216_s26   ;;  %s850_s15 = sshll.u32 %s1224_s28, 3 }
  0x25   : > { %p917_p7 = scmp.lt.s32.totalorder %s1228_s29, 2  ;;  %s849_s16 = sshll.u32 %s288_s14, 3 }
  0x26   : > { %s1540_s0 = sld [smem:[#allocation16_spill]]  ;;  %s292_s8 = scalar_lea.vmem [#allocation2], %s849_s16 }
  0x27   : > { %s301_s1 = sshll.u32 %s292_s8, 4  ;;  %p902_p11 = pnand %p917_p7, %p58_p4  ;;  %s302_s1 = int_to_ptr.vmem [resolvable:$true] %s301_s1 }
  0x28   : > { %s289_s23 = scalar_lea.sflag [#allocation3], %s288_s14  ;;  %s1374_s22 = sand.u32 (!%p1321_p3), 1, %s1212_s25  }
  0x29   : > { %s852_s2 = sshll.u32 (!%p1321_p3), %s1374_s22, 3  ;;  %s313_s17 = scalar_lea.sflag (!%p1321_p3), [#allocation3], %s1374_s22 }
  0x2a   : > { %310 = sbr.rel (%p1321_p3) target bundleno = 1083 (0x43b), region = 40 }
  0x2c   : > { %s297_s19 = scalar_lea.hbm %s1540_s0, %s850_s15  ;;  %s316_s15 = scalar_lea.vmem (!%p1321_p3), [#allocation2], %s852_s2 }
  0x2d   : > { %s299_s20 = sshll.u32 %s297_s19, 4  ;;  %s300_s20 = int_to_ptr.hbm [resolvable:$true] %s299_s20 }
  0x2e   : > { %904 = dma.hbm_to_vmem [thread:$0]  (!%p902_p11), %s300_s20, 128, %s302_s1, %s289_s23  }
  0x2f   : > { %1191 = dma.done.wait (%p1348_p13), %s313_s17, 128  }
  0x30   : > { %1193 = vsyncadd (%p1348_p13), %s313_s17, 4294967168 }
  0x31   : > { %1195 = dma.done.wait (%p63_p1), [#allocation6], 768  }
  0x32   : > { %1197 = vsyncadd (%p63_p1), [#allocation6], 4294966528  ;;  %v372_v0 = vld [vmem:[#allocation5 + $0x18] sm:$0xff]  ;;  %v371_v1 = vld [vmem:[#allocation5 + $0x10] sm:$0xff]  ;;  %vm373_vm0 = vcmask 261120   ;;  %vm400_vm1 = vcmask 130048  }
  0x33   : > { %389 = vmatpush.msra.mxu0 %v372_v0  ;;  %v370_v2 = vld [vmem:[#allocation5 + $0x8] sm:$0xff]  ;;  %v369_v3 = vld [vmem:[#allocation5] sm:$0xff]  ;;  %v368_v4 = vld [vmem:[%s316_s15] sm:$0xff]  ;;  %s1234_s1 = smov 96   ;;  %s1235_s2 = smov 112   ;;  %vm518_vm2 = vcmask 64512  }
  0x34   : > { %v398_v5 = vld [vmem:[#allocation7 + $0x8] sm:$0xff]  ;;  %v397_v6 = vld [vmem:[#allocation7] sm:$0xff]  ;;  %s1393_s11 = sshll.u32 %s1374_s22, 4  ;;  %s1541_s3 = sld [smem:[#allocation19_spill]] }
  0x35   : > { %390 = vmatpush.msra.mxu0 %v371_v1  ;;  %418 = vmatpush.msra.mxu1 %v398_v5  ;;  %s1396_s9 = scalar_lea.vmem [#allocation11], %s1393_s11  ;;  %s1405_s18 = scalar_lea.vmem [#allocation8], %s1393_s11 }
  0x36   : > { %442 = vmatpush.msra.mxu2 %v398_v5  ;;  %s1542_s4 = sld [smem:[#allocation20_spill]]  ;;  %s1236_s8 = smov 16  }
  0x37   : > { %391 = vmatpush.msra.mxu0 %v370_v2  ;;  %419 = vmatpush.msra.mxu1 %v397_v6  ;;  %s1237_s23 = smov 120   ;;  %s1238_s17 = smov 88  }
  0x38   : > { %443 = vmatpush.msra.mxu2 %v397_v6  ;;  %s1239_s15 = smov 104   ;;  %s875_s14 = sshll.u32 %s1220_s27, 4 }
  0x39   : > { %392 = vmatpush.msra.mxu0 %v369_v3  ;;  %s1543_s5 = sld [smem:[#allocation21_spill]] }
  0x3a   : > { %858 = vmatmul.msk.f32.vlgmr.msra.gmra.mxu0 %vm373_vm0, %v368_v4  ;;  %v983_v29 = vld [vmem:[%s1541_s3] ss:$0 sm:$0xff] }
  0x3c   : > { %v982_v54 = vld [vmem:[%s1542_s4] ss:$0 sm:$0xff] }
  0x3f   : > { %s633_s20 = scalar_lea.hbm %s1543_s5, %s875_s14 }
  0xb7   : > { %v1386_v7 = vpop.f32.mrf.mxu0 }
  0xb8   : > { %521 = vrot.lane.b32.xlu1 %v1386_v7, %s1234_s1  ;;  %v399_v8 = vmul.f32 %v1386_v7, %v1386_v7  ;;  %s1420_s1 = scalar_lea.vmem [#allocation9], %s1393_s11 }
  0xba   : > { %424 = vrot.lane.b32.xlu0 %v399_v8, %s1235_s2  ;;  %859 = vmatmul.msk.f32.vlgmr.msra.gmra.mxu1 %vm400_vm1, %v399_v8 }
 0x12a   : > { %v522_v9 = vpop.permute.xlu1 %521 }
 0x12b   : > { %524 = vst.msk [vmem:[%s1396_s9] sm:$0xff] %vm518_vm2, %v522_v9 }
 0x12c   : > { %v425_v10 = vpop.permute.xlu0 %424 }
 0x12d   : > { %860 = vmatmul.msk.f32.vlgmr.msra.gmra.mxu2 %vm400_vm1, %v425_v10 }
 0x137   : > { %v421_v11 = vpop.f32.mrf.mxu1 }
 0x138   : > { %984 = vrsqrt.f32 %v421_v11  ;;  %vm456_vm3 = vcmp.eq.f32.partialorder %v421_v11, inf  ;;  %v459_v19 = vand.u32 2147483648, %v421_v11  ;;  %vm458_vm4 = vcmp.eq.f32.partialorder %v421_v11, 0.0 }
 0x13e   : > { %v985_v12 = vpop.eup %984 }
 0x13f   : > { %v450_v13 = vmul.f32 %v985_v12, %v421_v11 }
 0x141   : > { %v451_v14 = vmul.f32 %v985_v12, %v450_v13 }
 0x143   : > { %v452_v15 = vmul.f32 0.5, %v451_v14 }
 0x145   : > { %v453_v16 = vsub.f32 1.5, %v452_v15 }
 0x147   : > { %v454_v17 = vmul.f32 %v985_v12, %v453_v16 }
 0x149   : > { %v455_v18 = vmul.f32 %v454_v17, %v421_v11 }
 0x14b   : > { %v457_v20 = vsel %vm456_vm3, %v421_v11, %v455_v18 }
 0x14c   : > { %v460_v21 = vsel %vm458_vm4, %v459_v19, %v457_v20 }
 0x14d   : > { %v461_v22 = vmax.f32 %v460_v21, 1e-12 }
 0x14f   : > { %986 = vrcp.f32 %v461_v22  ;;  %v476_v26 = vand.u32 2147483648, %v461_v22  ;;  %v474_v28 = vand.u32 2147483647, %v461_v22  ;;  %vm470_vm6 = vweird.f32 %v461_v22 }
 0x151   : > { %v477_v31 = vor.u32 1.1754944e-38, %v476_v26  ;;  %vm475_vm8 = vcmp.eq.f32.partialorder %v474_v28, 8.507059e+37 }
 0x155   : > { %v987_v23 = vpop.eup %986 }
 0x156   : > { %v466_v24 = vmul.f32 %v987_v23, %v461_v22  ;;  %vm471_vm5 = vweird.f32 %v987_v23 }
 0x157   : > { %vm472_vm7 = vmor %vm470_vm6, %vm471_vm5 }
 0x158   : > { %v467_v25 = vsub.f32 1.0, %v466_v24 }
 0x15a   : > { %v468_v27 = vmul.f32 %v987_v23, %v467_v25 }
 0x15c   : > { %v469_v30 = vadd.f32 %v987_v23, %v468_v27 }
 0x15e   : > { %v473_v32 = vsel %vm472_vm7, %v987_v23, %v469_v30 }
 0x15f   : > { %v478_v33 = vsel %vm475_vm8, %v477_v31, %v473_v32 }
 0x160   : > { %v479_v34 = vmul.f32 %v983_v29, %v478_v33 }
 0x162   : > { %v480_v35 = vmul.f32 %v479_v34, %v1386_v7 }
 0x164   : > { %519 = vst.msk [vmem:[%s1405_s18] sm:$0xff] %vm518_vm2, %v480_v35 }
 0x1b0   : > { %v445_v36 = vpop.f32.mrf.mxu2 }
 0x1b1   : > { %988 = vrsqrt.f32 %v445_v36  ;;  %vm489_vm9 = vcmp.eq.f32.partialorder %v445_v36, inf  ;;  %v492_v44 = vand.u32 2147483648, %v445_v36  ;;  %vm491_vm10 = vcmp.eq.f32.partialorder %v445_v36, 0.0 }
 0x1b7   : > { %v989_v37 = vpop.eup %988 }
 0x1b8   : > { %v483_v38 = vmul.f32 %v989_v37, %v445_v36 }
 0x1ba   : > { %v484_v39 = vmul.f32 %v989_v37, %v483_v38 }
 0x1bc   : > { %v485_v40 = vmul.f32 0.5, %v484_v39 }
 0x1be   : > { %v486_v41 = vsub.f32 1.5, %v485_v40 }
 0x1c0   : > { %v487_v42 = vmul.f32 %v989_v37, %v486_v41 }
 0x1c2   : > { %v488_v43 = vmul.f32 %v487_v42, %v445_v36 }
 0x1c4   : > { %v490_v45 = vsel %vm489_vm9, %v445_v36, %v488_v43 }
 0x1c5   : > { %v493_v46 = vsel %vm491_vm10, %v492_v44, %v490_v45 }
 0x1c6   : > { %v494_v47 = vmax.f32 %v493_v46, 1e-12 }
 0x1c8   : > { %990 = vrcp.f32 %v494_v47  ;;  %v509_v51 = vand.u32 2147483648, %v494_v47  ;;  %v507_v53 = vand.u32 2147483647, %v494_v47  ;;  %vm503_vm12 = vweird.f32 %v494_v47 }
 0x1ca   : > { %v510_v56 = vor.u32 1.1754944e-38, %v509_v51  ;;  %vm508_vm14 = vcmp.eq.f32.partialorder %v507_v53, 8.507059e+37 }
 0x1ce   : > { %v991_v48 = vpop.eup %990 }
 0x1cf   : > { %v499_v49 = vmul.f32 %v991_v48, %v494_v47  ;;  %vm504_vm11 = vweird.f32 %v991_v48 }
 0x1d0   : > { %vm505_vm13 = vmor %vm503_vm12, %vm504_vm11 }
 0x1d1   : > { %v500_v50 = vsub.f32 1.0, %v499_v49 }
 0x1d3   : > { %v501_v52 = vmul.f32 %v991_v48, %v500_v50 }
 0x1d5   : > { %v502_v55 = vadd.f32 %v991_v48, %v501_v52 }
 0x1d7   : > { %v506_v57 = vsel %vm505_vm13, %v991_v48, %v502_v55 }
 0x1d8   : > { %v511_v58 = vsel %vm508_vm14, %v510_v56, %v506_v57 }
 0x1d9   : > { %v512_v59 = vmul.f32 %v982_v54, %v511_v58 }
 0x1db   : > { %514 = vrot.lane.b32.xlu0 %v512_v59, %s1236_s8  ;;  %s636_s8 = sshll.u32 %s633_s20, 4  ;;  %s637_s8 = int_to_ptr.hbm [resolvable:$true] %s636_s8 }
 0x1e3   : > { %563 = vrot.lane.b32.xlu0 %v480_v35, %s1237_s23  ;;  %s611_s23 = scalar_lea.sflag [#allocation4], %s1374_s22 }
 0x24d   : > { %v515_v60 = vpop.permute.xlu0 %514 }
 0x24e   : > { %v517_v61 = vmul.f32 %v515_v60, %v1386_v7 }
 0x250   : > { %526 = vrot.lane.b32.xlu1 %v517_v61, %s1235_s2  ;;  %s634_s2 = sshll.u32 %s1405_s18, 4  ;;  %s635_s2 = int_to_ptr.vmem [resolvable:$true] %s634_s2 }
 0x255   : > { %v564_v62 = vpop.permute.xlu0 %563 }
 0x256   : > { %861 = vst.msk [vmem:[%s1405_s18 + $0x8] sm:$0xff] %vm518_vm2, %v564_v62  ;;  %s1102_s18 = scalar_lea.hbm %s1543_s5, 32 }
 0x258   : > { %568 = vrot.lane.b32.xlu1 %v1386_v7, %s1238_s17  ;;  %s1096_s17 = sshra.s32 %s637_s8, 4  ;;  %s1097_s17 = int_to_ptr.hbm [resolvable:$true] %s1096_s17 }
 0x259   : > { %p1103_p9 = scmp.lt.s32.totalorder %s1097_s17, %s1543_s5 }
 0x2c2   : > { %v527_v63 = vpop.permute.xlu1 %526 }
 0x2c3   : > { %529 = vxpose.xlu2.b32.start.end [1/1] (short) (narrow) %v527_v63, 8 }
 0x2ca   : > { %v569_v0 = vpop.permute.xlu1 %568 }
 0x2cb   : > { %862 = vst.msk [vmem:[%s1396_s9 + $0x8] sm:$0xff] %vm518_vm2, %v569_v0 }
 0x32c   : > { %573 = vrot.lane.b32.xlu2 %v517_v61, %s1239_s15  ;;  %s1098_s15 = scalar_lea.hbm %s1097_s17, 16 }
 0x32d   : > { %p1099_p1 = scmp.ne.s32.totalorder %s1097_s17, %s1098_s15  ;;  %p1104_p10 = scmp.lt.s32.totalorder %s1102_s18, %s1098_s15 }
 0x32f   : > { %p1100_p3 = pnand %p1099_p1, %p1352_p0  ;;  %p1105_p12 = por %p1104_p10, %p1103_p9 }
 0x331   : > { %p1101_p8 = pneg %p1100_p3 }
 0x333   : > { %p1106_p13 = pnand %p1105_p12, %p1101_p8 }
 0x35c   : > { %v545_v1 = vpop.trf.xlu2 }
 0x35d   : > { %561 = vst.msk [vmem:[%s1420_s1] sm:$0xff] %vm518_vm2, %v545_v1 }
 0x386   : > { %v574_v2 = vpop.permute.xlu2 %573 }
 0x387   : > { %576 = vxpose.xlu0.b32.start.end [1/1] (short) (narrow) %v574_v2, 8 }
 0x388   : > { %1109 = shalt.err (!%p1106_p13)
}
 0x389   : > { %s1240_s22 = smov 128   ;;  %s1241_s16 = smov 8  }
 0x38a   : > { %888 = dma.vmem_to_hbm [thread:$0]  (%p1352_p0), %s635_s2, 256, %s637_s8, %s611_s23, %s1240_s22, %s1240_s22, %s1241_s16  }
 0x38b   : > { %s651_s3 = scalar_lea.hbm %s1525_s6, %s875_s14  ;;  %s669_s15 = scalar_lea.hbm %s1526_s7, %s875_s14 }
 0x38c   : > { %s652_s11 = sshll.u32 %s1420_s1, 4  ;;  %s615_s18 = sand.u32 1, %s1313_s30   ;;  %s653_s11 = int_to_ptr.vmem [resolvable:$true] %s652_s11 }
 0x38d   : > { %s654_s27 = sshll.u32 %s651_s3, 4  ;;  %s670_s4 = sshll.u32 %s1396_s9, 4  ;;  %s655_s27 = int_to_ptr.hbm [resolvable:$true] %s654_s27  ;;  %s1454_s4 = int_to_ptr.vmem [resolvable:$true] %s670_s4 }
 0x38e   : > { %s1452_s5 = sshll.u32 %s669_s15, 4  ;;  %s1459_s2 = scalar_lea.sflag [#allocation10], %s615_s18  ;;  %s673_s5 = int_to_ptr.hbm [resolvable:$true] %s1452_s5 }
 0x38f   : > { %s1124_s8 = sshra.s32 %s655_s27, 4  ;;  %s1130_s23 = scalar_lea.hbm %s1525_s6, 32  ;;  %s1125_s8 = int_to_ptr.hbm [resolvable:$true] %s1124_s8 }
 0x390   : > { %s1126_s14 = scalar_lea.hbm %s1125_s8, 16  ;;  %p1131_p11 = scmp.lt.s32.totalorder %s1125_s8, %s1525_s6 }
 0x391   : > { %p1127_p2 = scmp.ne.s32.totalorder %s1125_s8, %s1126_s14  ;;  %p1132_p1 = scmp.lt.s32.totalorder %s1130_s23, %s1126_s14 }
 0x393   : > { %p1128_p4 = pnand %p1127_p2, %p1352_p0  ;;  %p1133_p3 = por %p1132_p1, %p1131_p11 }
 0x395   : > { %p1129_p7 = pneg %p1128_p4 }
 0x397   : > { %p1134_p8 = pnand %p1133_p3, %p1129_p7 }
 0x42b   : > { %v592_v3 = vpop.trf.xlu0 }
 0x42c   : > { %863 = vst.msk [vmem:[%s1420_s1 + $0x8] sm:$0xff] %vm518_vm2, %v592_v3 }
 0x42d   : > { %1137 = shalt.err (!%p1134_p8)
}
 0x42e   : > { %889 = dma.vmem_to_hbm [thread:$0]  (%p1352_p0), %s653_s11, 256, %s655_s27, %s1459_s2, %s1240_s22, %s1240_s22, %s1241_s16  }
 0x42f   : > { %s1152_s1 = sshra.s32 %s673_s5, 4  ;;  %s1158_s15 = scalar_lea.hbm %s1526_s7, 32  ;;  %s1153_s1 = int_to_ptr.hbm [resolvable:$true] %s1152_s1 }
 0x430   : > { %s1154_s3 = scalar_lea.hbm %s1153_s1, 16  ;;  %p1159_p13 = scmp.lt.s32.totalorder %s1153_s1, %s1526_s7 }
 0x431   : > { %p1155_p9 = scmp.ne.s32.totalorder %s1153_s1, %s1154_s3  ;;  %p1160_p2 = scmp.lt.s32.totalorder %s1158_s15, %s1154_s3 }
 0x433   : > { %p1156_p10 = pnand %p1155_p9, %p1352_p0  ;;  %p1161_p4 = por %p1160_p2, %p1159_p13 }
 0x435   : > { %p1157_p12 = pneg %p1156_p10 }
 0x437   : > { %p1162_p7 = pnand %p1161_p4, %p1157_p12 }
 0x439   : > { %1165 = shalt.err (!%p1162_p7)
}
 0x43a   : > { %890 = dma.vmem_to_hbm [thread:$0]  (%p1352_p0), %s1454_s4, 256, %s673_s5, %s1459_s2, %s1240_s22, %s1240_s22, %s1241_s16  }
 0x43b PF: > { %s687_s11 = sand.u32 1, %s1208_s24   ;;  %p906_p11 = pnand %p848_p6, %p1361_p5 }
 0x43c   : > { %s688_s27 = scalar_lea.sflag [#allocation4], %s687_s11 }
 0x43d   : > { %p907_p1 = pneg %p906_p11 }
 0x43f   : > { %1199 = dma.done.wait (%p907_p1), %s688_s27, 256  }
 0x440   : > { %1201 = vsyncadd (%p907_p1), %s688_s27, 4294967040  ;;  %s1544_s10 = sadd.s32 4294967294, %s1228_s29  }
 0x441   : > { %s697_s14 = sand.u32 1, %s1544_s10  }
 0x442   : > { %s698_s30 = scalar_lea.sflag [#allocation10], %s697_s14 }
 0x443   : > { %1203 = dma.done.wait (%p907_p1), %s698_s30, 512  }
 0x444   : > { %1205 = vsyncadd (%p907_p1), %s698_s30, 4294966784  ;;  %s28_s29 = sadd.s32 1, %s1228_s29   ;;  %s1545_s24 = smov %s1212_s25 }
 0x445   : > { %p25_p0 = scmp.ge.s32.totalorder %s28_s29, 4   ;;  %s1546_s25 = smov %s1216_s26 }
 0x446   : > { %s1547_s26 = smov %s1359_s12  ;;  %s1548_s27 = smov %s1224_s28 }
 0x447   : > { %s1549_s28 = smov %s1551_s21  ;;  %27 = sbr.rel (!%p25_p0) target bundleno = 16 (0x10), region = 128 }
 0x44c   :  { %714 = vsyncpa [#allocation3], 1 }
 0x44d   :  { %716 = vsyncpa [#allocation3 + $0x1], 1 }
 0x44e   :  { %717 = vsyncpa [#allocation6], 1 }
 0x44f   :  { %718 = vsyncpa [#allocation4], 1 }
 0x450   :  { %720 = vsyncpa [#allocation4 + $0x1], 1 }
 0x451   :  { %721 = vsyncpa [#allocation10], 1 }
 0x452   :  { %723 = vsyncpa [#allocation10 + $0x1], 1 }

</bundles_post_ra>
